<compile_context>
chip_gen: v7x
topology: tpu7x:2x2x1
jax: 0.10.0
libtpu: 0.0.40
codegen_flags: <defaults>
</compile_context>

<pallas_src>
from functools import partial

import jax
import jax.numpy as jnp
from jax import lax
from jax.experimental import pallas as pl
from jax.experimental.pallas import tpu as pltpu


# ------------------------------------------------------------------ fused kernel

def _fused_attention_kernel(x_ref, qkv_w_ref, proj_w_ref, proj_b_ref, o_ref,
                            qkv_scr, attn_scr, *, num_heads, scale):
    """Fused qkv-projection + multi-head SDPA + output projection.

    Block shapes (one grid step):
      x_ref      : (bB, N, C)   compute dtype (bf16 default)
      qkv_w_ref  : (C, 3C)      VMEM-resident (constant index_map)
      proj_w_ref : (C, C)       VMEM-resident (constant index_map)
      proj_b_ref : (1, C)       VMEM-resident
      o_ref      : (bB, N, C)
      qkv_scr    : (N, 3C)      VMEM scratch -- qkv intermediate, never hits HBM
      attn_scr   : (N, C)       VMEM scratch -- per-batch attention output
    """
    bB, N, C = x_ref.shape
    D = C // num_heads

    def one_head(h):
        lo = h * D
        q = qkv_scr[:, lo:lo + D]                    # (N, D)
        k = qkv_scr[:, C + lo:C + lo + D]            # (N, D)
        v = qkv_scr[:, 2 * C + lo:2 * C + lo + D]    # (N, D)
        # q @ k^T by contracting the last dims -- no explicit transpose of k.
        s = lax.dot_general(q, k, (((1,), (1,)), ((), ())),
                            preferred_element_type=jnp.float32)   # (N, N) fp32
        s = s * scale                 # scale applied to fp32 scores, not bf16 q
        m = jnp.max(s, axis=-1, keepdims=True)
        p = jnp.exp(s - m)
        # Exact denominator (pl.reciprocal(approx=True) is faster but loosens
        # the match vs. the reference -- only use for pure inference).
        p = p / jnp.sum(p, axis=-1, keepdims=True)
        return jnp.dot(p.astype(v.dtype), v,
                       preferred_element_type=jnp.float32)         # (N, D) fp32

    for b in range(bB):   # static unroll over the batch elements of this block
        # ---- fused qkv projection: single full-K MXU matmul, fp32 accumulate.
        qkv_scr[...] = jnp.dot(
            x_ref[b], qkv_w_ref[...],
            preferred_element_type=jnp.float32).astype(qkv_scr.dtype)

        # ---- multi-head attention, results streamed into attn_scr as produced.
        # Heads are paired so each store is a (N, 2*D) slab (128 lanes at
        # DeiT's D=64) and at most two head results are live at any time.
        for pr in range(num_heads // 2):
            lo = 2 * pr * D
            o_pair = jnp.concatenate(
                [one_head(2 * pr), one_head(2 * pr + 1)], axis=-1)   # (N, 2D)
            attn_scr[:, lo:lo + 2 * D] = o_pair.astype(attn_scr.dtype)
        if num_heads % 2:
            h = num_heads - 1
            attn_scr[:, h * D:(h + 1) * D] = one_head(h).astype(attn_scr.dtype)

        # ---- fused output projection (+ bias): single lane-dense (N, C) store.
        out = jnp.dot(attn_scr[...], proj_w_ref[...],
                      preferred_element_type=jnp.float32)
        o_ref[b] = (out + proj_b_ref[...].astype(jnp.float32)).astype(o_ref.dtype)


def _pick_batch_block(B, max_block=8):
    """Largest divisor of B that is <= max_block (amortize grid-step overhead)."""
    for cand in range(min(max_block, B), 0, -1):
        if B % cand == 0:
            return cand
    return 1


def fused_attention(x, qkv_w_t, proj_w_t, proj_b, num_heads, scale):
    """x: (B, N, C); qkv_w_t: (C, 3C); proj_w_t: (C, C); proj_b: (C,)."""
    B, N, C = x.shape
    assert qkv_w_t.shape == (C, 3 * C) and proj_w_t.shape == (C, C)
    bB = _pick_batch_block(B)
    cdt = x.dtype

    return pl.pallas_call(
        partial(_fused_attention_kernel, num_heads=num_heads, scale=scale),
        out_shape=jax.ShapeDtypeStruct((B, N, C), cdt),
        grid=(B // bB,),
        in_specs=[
            pl.BlockSpec((bB, N, C), lambda i: (i, 0, 0)),   # x: streamed per step
            pl.BlockSpec((C, 3 * C), lambda i: (0, 0)),      # qkv_w: VMEM-resident
            pl.BlockSpec((C, C), lambda i: (0, 0)),          # proj_w: VMEM-resident
            pl.BlockSpec((1, C), lambda i: (0, 0)),          # proj_b: VMEM-resident
        ],
        out_specs=pl.BlockSpec((bB, N, C), lambda i: (i, 0, 0)),
        scratch_shapes=[
            pltpu.VMEM((N, 3 * C), cdt),   # qkv intermediate (no HBM round trip)
            pltpu.VMEM((N, C), cdt),       # attention output (no HBM round trip)
        ],
        compiler_params=pltpu.CompilerParams(
            dimension_semantics=("parallel",),
            # Explicit budget: fits v7x (64 MiB physical) and lifts v5e's
            # 16 MiB scoped default.
            vmem_limit_bytes=48 * 1024 * 1024,
        ),
    )(x, qkv_w_t, proj_w_t, proj_b.reshape(1, C))


# ------------------------------------------------------------------ module forward

def prepare_params(torch_params):
    """Convert PyTorch-layout (out, in) weights to (in, out) ONCE, outside forward."""
    return {
        "qkv_w_t": torch_params["qkv_w"].T,    # (C, 3C)
        "proj_w_t": torch_params["proj_w"].T,  # (C, C)
        "proj_b": torch_params["proj_b"],      # (C,)
    }


def attention_forward(x, params, num_heads, compute_dtype=jnp.bfloat16):
    """Exact forward of the PyTorch Attention module (eval mode, dropout=0).

    Default: bf16 matmuls (MXU-native on v5e/v6e/v7x) with fp32 accumulation
    and fp32 softmax.  Pass compute_dtype=jnp.float32 for a debug path.
    """
    B, N, C = x.shape
    D = C // num_heads
    scale = D ** (-0.5)

    out = fused_attention(
        x.astype(compute_dtype),
        params["qkv_w_t"].astype(compute_dtype),
        params["proj_w_t"].astype(compute_dtype),
        params["proj_b"].astype(compute_dtype),
        num_heads, scale)
    return out.astype(x.dtype)


# ------------------------------------------------------------------ pure-JAX reference

def attention_reference(x, torch_params, num_heads):
    B, N, C = x.shape
    D = C // num_heads
    scale = D ** (-0.5)
    qkv = x @ torch_params["qkv_w"].T
    qkv = qkv.reshape(B, N, 3, num_heads, D).transpose(2, 0, 3, 1, 4)
    q, k, v = qkv[0], qkv[1], qkv[2]
    attn = jax.nn.softmax(jnp.einsum("bhqd,bhkd->bhqk", q, k) * scale, axis=-1)
    o = jnp.einsum("bhqk,bhkd->bhqd", attn, v)
    o = o.transpose(0, 2, 1, 3).reshape(B, N, C)
    return o @ torch_params["proj_w"].T + torch_params["proj_b"]


# ------------------------------------------------------------------ main

if __name__ == "__main__":
    B, N, C = 2, 8, 32
    num_heads = 8

    key = jax.random.PRNGKey(0)
    kx, kqkv, kproj_w, kproj_b = jax.random.split(key, 4)

    x = jax.random.normal(kx, (B, N, C), dtype=jnp.float32)

    # Parameters in PyTorch nn.Linear layout: weight is (out_features, in_features).
    torch_params = {
        "qkv_w": jax.random.normal(kqkv, (3 * C, C), dtype=jnp.float32) * 0.05,
        "proj_w": jax.random.normal(kproj_w, (C, C), dtype=jnp.float32) * 0.05,
        "proj_b": jax.random.normal(kproj_b, (C,), dtype=jnp.float32) * 0.05,
    }
    params = prepare_params(torch_params)   # weight transposes hoisted out of forward

    ref = attention_reference(x, torch_params, num_heads)

    # Default bf16 compute path (fp32 accumulation + fp32 softmax).
    out = jax.block_until_ready(attention_forward(x, params, num_heads))
    assert out.shape == (B, N, C)
    err = float(jnp.max(jnp.abs(out - ref)))
    assert jnp.allclose(out, ref, atol=6e-2, rtol=6e-2), (
        f"bf16 path mismatch vs JAX reference, max abs err = {err}")

    # fp32 debug path.
    out32 = jax.block_until_ready(
        attention_forward(x, params, num_heads, compute_dtype=jnp.float32))
    err32 = float(jnp.max(jnp.abs(out32 - ref)))
    assert jnp.allclose(out32, ref, atol=2e-2, rtol=2e-2), (
        f"fp32 path mismatch vs JAX reference, max abs err = {err32}")

    print("KERNEL_OK")
</pallas_src>

<mosaic_0001>
module attributes {stable_mosaic.version = 11 : i64} {
  func.func @_fused_attention_kernel(%arg0: i32, %arg1: memref<2x8x32xbf16, #tpu.memory_space<vmem>>, %arg2: memref<32x96xbf16, #tpu.memory_space<vmem>>, %arg3: memref<32x32xbf16, #tpu.memory_space<vmem>>, %arg4: memref<1x32xbf16, #tpu.memory_space<vmem>>, %arg5: memref<2x8x32xbf16, #tpu.memory_space<vmem>>, %arg6: memref<8x96xbf16, #tpu.memory_space<vmem>>, %arg7: memref<8x32xbf16, #tpu.memory_space<vmem>>) attributes {dimension_semantics = [#tpu.dimension_semantics<parallel>], iteration_bounds = array<i64: 1>, scalar_prefetch = 0 : i64, scratch_operands = 2 : i64, tpu.core_type = #tpu.core_type<tc>, window_params = [{transform_indices = @transform_0, window_bounds = array<i64: 2, 8, 32>}, {pipeline_mode = #tpu.pipeline_mode<synchronous>, transform_indices = @transform_1, window_bounds = array<i64: 32, 96>}, {pipeline_mode = #tpu.pipeline_mode<synchronous>, transform_indices = @transform_2, window_bounds = array<i64: 32, 32>}, {pipeline_mode = #tpu.pipeline_mode<synchronous>, transform_indices = @transform_3, window_bounds = array<i64: 1, 32>}, {transform_indices = @transform_4, window_bounds = array<i64: 2, 8, 32>}]} {
    %c0 = arith.constant 0 : index
    %c0_0 = arith.constant 0 : index
    %c0_1 = arith.constant 0 : index
    %0 = vector.load %arg1[%c0, %c0_0, %c0_1] : memref<2x8x32xbf16, #tpu.memory_space<vmem>>, vector<1x8x32xbf16>
    %1 = vector.shape_cast %0 : vector<1x8x32xbf16> to vector<8x32xbf16>
    %c0_2 = arith.constant 0 : index
    %c0_3 = arith.constant 0 : index
    %2 = vector.load %arg2[%c0_2, %c0_3] : memref<32x96xbf16, #tpu.memory_space<vmem>>, vector<32x96xbf16>
    %cst = arith.constant dense<0.000000e+00> : vector<8x96xf32>
    %3 = tpu.matmul %1, %2, %cst {dimension_numbers = #tpu.dot_dimension_numbers<[1], [0], [0], [1], [0, 0, 1, 1], [], []>} : vector<8x32xbf16>, vector<32x96xbf16>, vector<8x96xf32> -> vector<8x96xf32>
    %4 = arith.truncf %3 : vector<8x96xf32> to vector<8x96xbf16>
    %c0_4 = arith.constant 0 : index
    %c0_5 = arith.constant 0 : index
    %5 = vector.load %arg6[%c0_4, %c0_5] : memref<8x96xbf16, #tpu.memory_space<vmem>>, vector<8x96xbf16>
    tpu.vector_store %arg6[%c0_4, %c0_5], %4 {strides = array<i32>} : memref<8x96xbf16, #tpu.memory_space<vmem>>, vector<8x96xbf16>,
    %c0_6 = arith.constant 0 : index
    %c0_7 = arith.constant 0 : index
    %6 = vector.load %arg6[%c0_6, %c0_7] : memref<8x96xbf16, #tpu.memory_space<vmem>>, vector<8x4xbf16>
    %c0_8 = arith.constant 0 : index
    %c32 = arith.constant 32 : index
    %7 = vector.load %arg6[%c0_8, %c32] : memref<8x96xbf16, #tpu.memory_space<vmem>>, vector<8x4xbf16>
    %c0_9 = arith.constant 0 : index
    %c64 = arith.constant 64 : index
    %8 = vector.load %arg6[%c0_9, %c64] : memref<8x96xbf16, #tpu.memory_space<vmem>>, vector<8x4xbf16>
    %cst_10 = arith.constant dense<0.000000e+00> : vector<8x8xf32>
    %9 = tpu.matmul %6, %7, %cst_10 {dimension_numbers = #tpu.dot_dimension_numbers<[1], [1], [0], [0], [0, 0, 1, 0], [], []>} : vector<8x4xbf16>, vector<8x4xbf16>, vector<8x8xf32> -> vector<8x8xf32>
    %cst_11 = arith.constant 5.000000e-01 : f32
    %10 = vector.broadcast %cst_11 : f32 to vector<8x8xf32>
    %11 = arith.mulf %9, %10 : vector<8x8xf32>
    %cst_12 = arith.constant dense<0xFF800000> : vector<8xf32>
    %12 = vector.multi_reduction <maximumf>, %11, %cst_12 [1] : vector<8x8xf32> to vector<8xf32>
    %13 = vector.shape_cast %12 : vector<8xf32> to vector<8x1xf32>
    %14 = vector.broadcast %13 : vector<8x1xf32> to vector<8x8xf32>
    %15 = arith.subf %11, %14 : vector<8x8xf32>
    %16 = math.exp %15 : vector<8x8xf32>
    %cst_13 = arith.constant dense<0.000000e+00> : vector<8xf32>
    %17 = vector.multi_reduction <add>, %16, %cst_13 [1] : vector<8x8xf32> to vector<8xf32>
    %18 = vector.shape_cast %17 : vector<8xf32> to vector<8x1xf32>
    %19 = vector.broadcast %18 : vector<8x1xf32> to vector<8x8xf32>
    %20 = arith.divf %16, %19 : vector<8x8xf32>
    %21 = arith.truncf %20 : vector<8x8xf32> to vector<8x8xbf16>
    %cst_14 = arith.constant dense<0.000000e+00> : vector<8x4xf32>
    %22 = tpu.matmul %21, %8, %cst_14 {dimension_numbers = #tpu.dot_dimension_numbers<[1], [0], [0], [1], [0, 0, 1, 1], [], []>} : vector<8x8xbf16>, vector<8x4xbf16>, vector<8x4xf32> -> vector<8x4xf32>
    %c0_15 = arith.constant 0 : index
    %c4 = arith.constant 4 : index
    %23 = vector.load %arg6[%c0_15, %c4] : memref<8x96xbf16, #tpu.memory_space<vmem>>, vector<8x4xbf16>
    %c0_16 = arith.constant 0 : index
    %c36 = arith.constant 36 : index
    %24 = vector.load %arg6[%c0_16, %c36] : memref<8x96xbf16, #tpu.memory_space<vmem>>, vector<8x4xbf16>
    %c0_17 = arith.constant 0 : index
    %c68 = arith.constant 68 : index
    %25 = vector.load %arg6[%c0_17, %c68] : memref<8x96xbf16, #tpu.memory_space<vmem>>, vector<8x4xbf16>
    %cst_18 = arith.constant dense<0.000000e+00> : vector<8x8xf32>
    %26 = tpu.matmul %23, %24, %cst_18 {dimension_numbers = #tpu.dot_dimension_numbers<[1], [1], [0], [0], [0, 0, 1, 0], [], []>} : vector<8x4xbf16>, vector<8x4xbf16>, vector<8x8xf32> -> vector<8x8xf32>
    %cst_19 = arith.constant 5.000000e-01 : f32
    %27 = vector.broadcast %cst_19 : f32 to vector<8x8xf32>
    %28 = arith.mulf %26, %27 : vector<8x8xf32>
    %cst_20 = arith.constant dense<0xFF800000> : vector<8xf32>
    %29 = vector.multi_reduction <maximumf>, %28, %cst_20 [1] : vector<8x8xf32> to vector<8xf32>
    %30 = vector.shape_cast %29 : vector<8xf32> to vector<8x1xf32>
    %31 = vector.broadcast %30 : vector<8x1xf32> to vector<8x8xf32>
    %32 = arith.subf %28, %31 : vector<8x8xf32>
    %33 = math.exp %32 : vector<8x8xf32>
    %cst_21 = arith.constant dense<0.000000e+00> : vector<8xf32>
    %34 = vector.multi_reduction <add>, %33, %cst_21 [1] : vector<8x8xf32> to vector<8xf32>
    %35 = vector.shape_cast %34 : vector<8xf32> to vector<8x1xf32>
    %36 = vector.broadcast %35 : vector<8x1xf32> to vector<8x8xf32>
    %37 = arith.divf %33, %36 : vector<8x8xf32>
    %38 = arith.truncf %37 : vector<8x8xf32> to vector<8x8xbf16>
    %cst_22 = arith.constant dense<0.000000e+00> : vector<8x4xf32>
    %39 = tpu.matmul %38, %25, %cst_22 {dimension_numbers = #tpu.dot_dimension_numbers<[1], [0], [0], [1], [0, 0, 1, 1], [], []>} : vector<8x8xbf16>, vector<8x4xbf16>, vector<8x4xf32> -> vector<8x4xf32>
    %40 = tpu.concatenate %22, %39 in 1 : vector<8x4xf32>, vector<8x4xf32> -> vector<8x8xf32>
    %41 = arith.truncf %40 : vector<8x8xf32> to vector<8x8xbf16>
    %c0_23 = arith.constant 0 : index
    %c0_24 = arith.constant 0 : index
    %42 = vector.load %arg7[%c0_23, %c0_24] : memref<8x32xbf16, #tpu.memory_space<vmem>>, vector<8x8xbf16>
    tpu.vector_store %arg7[%c0_23, %c0_24], %41 {strides = array<i32>} : memref<8x32xbf16, #tpu.memory_space<vmem>>, vector<8x8xbf16>,
    %c0_25 = arith.constant 0 : index
    %c8 = arith.constant 8 : index
    %43 = vector.load %arg6[%c0_25, %c8] : memref<8x96xbf16, #tpu.memory_space<vmem>>, vector<8x4xbf16>
    %c0_26 = arith.constant 0 : index
    %c40 = arith.constant 40 : index
    %44 = vector.load %arg6[%c0_26, %c40] : memref<8x96xbf16, #tpu.memory_space<vmem>>, vector<8x4xbf16>
    %c0_27 = arith.constant 0 : index
    %c72 = arith.constant 72 : index
    %45 = vector.load %arg6[%c0_27, %c72] : memref<8x96xbf16, #tpu.memory_space<vmem>>, vector<8x4xbf16>
    %cst_28 = arith.constant dense<0.000000e+00> : vector<8x8xf32>
    %46 = tpu.matmul %43, %44, %cst_28 {dimension_numbers = #tpu.dot_dimension_numbers<[1], [1], [0], [0], [0, 0, 1, 0], [], []>} : vector<8x4xbf16>, vector<8x4xbf16>, vector<8x8xf32> -> vector<8x8xf32>
    %cst_29 = arith.constant 5.000000e-01 : f32
    %47 = vector.broadcast %cst_29 : f32 to vector<8x8xf32>
    %48 = arith.mulf %46, %47 : vector<8x8xf32>
    %cst_30 = arith.constant dense<0xFF800000> : vector<8xf32>
    %49 = vector.multi_reduction <maximumf>, %48, %cst_30 [1] : vector<8x8xf32> to vector<8xf32>
    %50 = vector.shape_cast %49 : vector<8xf32> to vector<8x1xf32>
    %51 = vector.broadcast %50 : vector<8x1xf32> to vector<8x8xf32>
    %52 = arith.subf %48, %51 : vector<8x8xf32>
    %53 = math.exp %52 : vector<8x8xf32>
    %cst_31 = arith.constant dense<0.000000e+00> : vector<8xf32>
    %54 = vector.multi_reduction <add>, %53, %cst_31 [1] : vector<8x8xf32> to vector<8xf32>
    %55 = vector.shape_cast %54 : vector<8xf32> to vector<8x1xf32>
    %56 = vector.broadcast %55 : vector<8x1xf32> to vector<8x8xf32>
    %57 = arith.divf %53, %56 : vector<8x8xf32>
    %58 = arith.truncf %57 : vector<8x8xf32> to vector<8x8xbf16>
    %cst_32 = arith.constant dense<0.000000e+00> : vector<8x4xf32>
    %59 = tpu.matmul %58, %45, %cst_32 {dimension_numbers = #tpu.dot_dimension_numbers<[1], [0], [0], [1], [0, 0, 1, 1], [], []>} : vector<8x8xbf16>, vector<8x4xbf16>, vector<8x4xf32> -> vector<8x4xf32>
    %c0_33 = arith.constant 0 : index
    %c12 = arith.constant 12 : index
    %60 = vector.load %arg6[%c0_33, %c12] : memref<8x96xbf16, #tpu.memory_space<vmem>>, vector<8x4xbf16>
    %c0_34 = arith.constant 0 : index
    %c44 = arith.constant 44 : index
    %61 = vector.load %arg6[%c0_34, %c44] : memref<8x96xbf16, #tpu.memory_space<vmem>>, vector<8x4xbf16>
    %c0_35 = arith.constant 0 : index
    %c76 = arith.constant 76 : index
    %62 = vector.load %arg6[%c0_35, %c76] : memref<8x96xbf16, #tpu.memory_space<vmem>>, vector<8x4xbf16>
    %cst_36 = arith.constant dense<0.000000e+00> : vector<8x8xf32>
    %63 = tpu.matmul %60, %61, %cst_36 {dimension_numbers = #tpu.dot_dimension_numbers<[1], [1], [0], [0], [0, 0, 1, 0], [], []>} : vector<8x4xbf16>, vector<8x4xbf16>, vector<8x8xf32> -> vector<8x8xf32>
    %cst_37 = arith.constant 5.000000e-01 : f32
    %64 = vector.broadcast %cst_37 : f32 to vector<8x8xf32>
    %65 = arith.mulf %63, %64 : vector<8x8xf32>
    %cst_38 = arith.constant dense<0xFF800000> : vector<8xf32>
    %66 = vector.multi_reduction <maximumf>, %65, %cst_38 [1] : vector<8x8xf32> to vector<8xf32>
    %67 = vector.shape_cast %66 : vector<8xf32> to vector<8x1xf32>
    %68 = vector.broadcast %67 : vector<8x1xf32> to vector<8x8xf32>
    %69 = arith.subf %65, %68 : vector<8x8xf32>
    %70 = math.exp %69 : vector<8x8xf32>
    %cst_39 = arith.constant dense<0.000000e+00> : vector<8xf32>
    %71 = vector.multi_reduction <add>, %70, %cst_39 [1] : vector<8x8xf32> to vector<8xf32>
    %72 = vector.shape_cast %71 : vector<8xf32> to vector<8x1xf32>
    %73 = vector.broadcast %72 : vector<8x1xf32> to vector<8x8xf32>
    %74 = arith.divf %70, %73 : vector<8x8xf32>
    %75 = arith.truncf %74 : vector<8x8xf32> to vector<8x8xbf16>
    %cst_40 = arith.constant dense<0.000000e+00> : vector<8x4xf32>
    %76 = tpu.matmul %75, %62, %cst_40 {dimension_numbers = #tpu.dot_dimension_numbers<[1], [0], [0], [1], [0, 0, 1, 1], [], []>} : vector<8x8xbf16>, vector<8x4xbf16>, vector<8x4xf32> -> vector<8x4xf32>
    %77 = tpu.concatenate %59, %76 in 1 : vector<8x4xf32>, vector<8x4xf32> -> vector<8x8xf32>
    %78 = arith.truncf %77 : vector<8x8xf32> to vector<8x8xbf16>
    %c0_41 = arith.constant 0 : index
    %c8_42 = arith.constant 8 : index
    %79 = vector.load %arg7[%c0_41, %c8_42] : memref<8x32xbf16, #tpu.memory_space<vmem>>, vector<8x8xbf16>
    tpu.vector_store %arg7[%c0_41, %c8_42], %78 {strides = array<i32>} : memref<8x32xbf16, #tpu.memory_space<vmem>>, vector<8x8xbf16>,
    %c0_43 = arith.constant 0 : index
    %c16 = arith.constant 16 : index
    %80 = vector.load %arg6[%c0_43, %c16] : memref<8x96xbf16, #tpu.memory_space<vmem>>, vector<8x4xbf16>
    %c0_44 = arith.constant 0 : index
    %c48 = arith.constant 48 : index
    %81 = vector.load %arg6[%c0_44, %c48] : memref<8x96xbf16, #tpu.memory_space<vmem>>, vector<8x4xbf16>
    %c0_45 = arith.constant 0 : index
    %c80 = arith.constant 80 : index
    %82 = vector.load %arg6[%c0_45, %c80] : memref<8x96xbf16, #tpu.memory_space<vmem>>, vector<8x4xbf16>
    %cst_46 = arith.constant dense<0.000000e+00> : vector<8x8xf32>
    %83 = tpu.matmul %80, %81, %cst_46 {dimension_numbers = #tpu.dot_dimension_numbers<[1], [1], [0], [0], [0, 0, 1, 0], [], []>} : vector<8x4xbf16>, vector<8x4xbf16>, vector<8x8xf32> -> vector<8x8xf32>
    %cst_47 = arith.constant 5.000000e-01 : f32
    %84 = vector.broadcast %cst_47 : f32 to vector<8x8xf32>
    %85 = arith.mulf %83, %84 : vector<8x8xf32>
    %cst_48 = arith.constant dense<0xFF800000> : vector<8xf32>
    %86 = vector.multi_reduction <maximumf>, %85, %cst_48 [1] : vector<8x8xf32> to vector<8xf32>
    %87 = vector.shape_cast %86 : vector<8xf32> to vector<8x1xf32>
    %88 = vector.broadcast %87 : vector<8x1xf32> to vector<8x8xf32>
    %89 = arith.subf %85, %88 : vector<8x8xf32>
    %90 = math.exp %89 : vector<8x8xf32>
    %cst_49 = arith.constant dense<0.000000e+00> : vector<8xf32>
    %91 = vector.multi_reduction <add>, %90, %cst_49 [1] : vector<8x8xf32> to vector<8xf32>
    %92 = vector.shape_cast %91 : vector<8xf32> to vector<8x1xf32>
    %93 = vector.broadcast %92 : vector<8x1xf32> to vector<8x8xf32>
    %94 = arith.divf %90, %93 : vector<8x8xf32>
    %95 = arith.truncf %94 : vector<8x8xf32> to vector<8x8xbf16>
    %cst_50 = arith.constant dense<0.000000e+00> : vector<8x4xf32>
    %96 = tpu.matmul %95, %82, %cst_50 {dimension_numbers = #tpu.dot_dimension_numbers<[1], [0], [0], [1], [0, 0, 1, 1], [], []>} : vector<8x8xbf16>, vector<8x4xbf16>, vector<8x4xf32> -> vector<8x4xf32>
    %c0_51 = arith.constant 0 : index
    %c20 = arith.constant 20 : index
    %97 = vector.load %arg6[%c0_51, %c20] : memref<8x96xbf16, #tpu.memory_space<vmem>>, vector<8x4xbf16>
    %c0_52 = arith.constant 0 : index
    %c52 = arith.constant 52 : index
    %98 = vector.load %arg6[%c0_52, %c52] : memref<8x96xbf16, #tpu.memory_space<vmem>>, vector<8x4xbf16>
    %c0_53 = arith.constant 0 : index
    %c84 = arith.constant 84 : index
    %99 = vector.load %arg6[%c0_53, %c84] : memref<8x96xbf16, #tpu.memory_space<vmem>>, vector<8x4xbf16>
    %cst_54 = arith.constant dense<0.000000e+00> : vector<8x8xf32>
    %100 = tpu.matmul %97, %98, %cst_54 {dimension_numbers = #tpu.dot_dimension_numbers<[1], [1], [0], [0], [0, 0, 1, 0], [], []>} : vector<8x4xbf16>, vector<8x4xbf16>, vector<8x8xf32> -> vector<8x8xf32>
    %cst_55 = arith.constant 5.000000e-01 : f32
    %101 = vector.broadcast %cst_55 : f32 to vector<8x8xf32>
    %102 = arith.mulf %100, %101 : vector<8x8xf32>
    %cst_56 = arith.constant dense<0xFF800000> : vector<8xf32>
    %103 = vector.multi_reduction <maximumf>, %102, %cst_56 [1] : vector<8x8xf32> to vector<8xf32>
    %104 = vector.shape_cast %103 : vector<8xf32> to vector<8x1xf32>
    %105 = vector.broadcast %104 : vector<8x1xf32> to vector<8x8xf32>
    %106 = arith.subf %102, %105 : vector<8x8xf32>
    %107 = math.exp %106 : vector<8x8xf32>
    %cst_57 = arith.constant dense<0.000000e+00> : vector<8xf32>
    %108 = vector.multi_reduction <add>, %107, %cst_57 [1] : vector<8x8xf32> to vector<8xf32>
    %109 = vector.shape_cast %108 : vector<8xf32> to vector<8x1xf32>
    %110 = vector.broadcast %109 : vector<8x1xf32> to vector<8x8xf32>
    %111 = arith.divf %107, %110 : vector<8x8xf32>
    %112 = arith.truncf %111 : vector<8x8xf32> to vector<8x8xbf16>
    %cst_58 = arith.constant dense<0.000000e+00> : vector<8x4xf32>
    %113 = tpu.matmul %112, %99, %cst_58 {dimension_numbers = #tpu.dot_dimension_numbers<[1], [0], [0], [1], [0, 0, 1, 1], [], []>} : vector<8x8xbf16>, vector<8x4xbf16>, vector<8x4xf32> -> vector<8x4xf32>
    %114 = tpu.concatenate %96, %113 in 1 : vector<8x4xf32>, vector<8x4xf32> -> vector<8x8xf32>
    %115 = arith.truncf %114 : vector<8x8xf32> to vector<8x8xbf16>
    %c0_59 = arith.constant 0 : index
    %c16_60 = arith.constant 16 : index
    %116 = vector.load %arg7[%c0_59, %c16_60] : memref<8x32xbf16, #tpu.memory_space<vmem>>, vector<8x8xbf16>
    tpu.vector_store %arg7[%c0_59, %c16_60], %115 {strides = array<i32>} : memref<8x32xbf16, #tpu.memory_space<vmem>>, vector<8x8xbf16>,
    %c0_61 = arith.constant 0 : index
    %c24 = arith.constant 24 : index
    %117 = vector.load %arg6[%c0_61, %c24] : memref<8x96xbf16, #tpu.memory_space<vmem>>, vector<8x4xbf16>
    %c0_62 = arith.constant 0 : index
    %c56 = arith.constant 56 : index
    %118 = vector.load %arg6[%c0_62, %c56] : memref<8x96xbf16, #tpu.memory_space<vmem>>, vector<8x4xbf16>
    %c0_63 = arith.constant 0 : index
    %c88 = arith.constant 88 : index
    %119 = vector.load %arg6[%c0_63, %c88] : memref<8x96xbf16, #tpu.memory_space<vmem>>, vector<8x4xbf16>
    %cst_64 = arith.constant dense<0.000000e+00> : vector<8x8xf32>
    %120 = tpu.matmul %117, %118, %cst_64 {dimension_numbers = #tpu.dot_dimension_numbers<[1], [1], [0], [0], [0, 0, 1, 0], [], []>} : vector<8x4xbf16>, vector<8x4xbf16>, vector<8x8xf32> -> vector<8x8xf32>
    %cst_65 = arith.constant 5.000000e-01 : f32
    %121 = vector.broadcast %cst_65 : f32 to vector<8x8xf32>
    %122 = arith.mulf %120, %121 : vector<8x8xf32>
    %cst_66 = arith.constant dense<0xFF800000> : vector<8xf32>
    %123 = vector.multi_reduction <maximumf>, %122, %cst_66 [1] : vector<8x8xf32> to vector<8xf32>
    %124 = vector.shape_cast %123 : vector<8xf32> to vector<8x1xf32>
    %125 = vector.broadcast %124 : vector<8x1xf32> to vector<8x8xf32>
    %126 = arith.subf %122, %125 : vector<8x8xf32>
    %127 = math.exp %126 : vector<8x8xf32>
    %cst_67 = arith.constant dense<0.000000e+00> : vector<8xf32>
    %128 = vector.multi_reduction <add>, %127, %cst_67 [1] : vector<8x8xf32> to vector<8xf32>
    %129 = vector.shape_cast %128 : vector<8xf32> to vector<8x1xf32>
    %130 = vector.broadcast %129 : vector<8x1xf32> to vector<8x8xf32>
    %131 = arith.divf %127, %130 : vector<8x8xf32>
    %132 = arith.truncf %131 : vector<8x8xf32> to vector<8x8xbf16>
    %cst_68 = arith.constant dense<0.000000e+00> : vector<8x4xf32>
    %133 = tpu.matmul %132, %119, %cst_68 {dimension_numbers = #tpu.dot_dimension_numbers<[1], [0], [0], [1], [0, 0, 1, 1], [], []>} : vector<8x8xbf16>, vector<8x4xbf16>, vector<8x4xf32> -> vector<8x4xf32>
    %c0_69 = arith.constant 0 : index
    %c28 = arith.constant 28 : index
    %134 = vector.load %arg6[%c0_69, %c28] : memref<8x96xbf16, #tpu.memory_space<vmem>>, vector<8x4xbf16>
    %c0_70 = arith.constant 0 : index
    %c60 = arith.constant 60 : index
    %135 = vector.load %arg6[%c0_70, %c60] : memref<8x96xbf16, #tpu.memory_space<vmem>>, vector<8x4xbf16>
    %c0_71 = arith.constant 0 : index
    %c92 = arith.constant 92 : index
    %136 = vector.load %arg6[%c0_71, %c92] : memref<8x96xbf16, #tpu.memory_space<vmem>>, vector<8x4xbf16>
    %cst_72 = arith.constant dense<0.000000e+00> : vector<8x8xf32>
    %137 = tpu.matmul %134, %135, %cst_72 {dimension_numbers = #tpu.dot_dimension_numbers<[1], [1], [0], [0], [0, 0, 1, 0], [], []>} : vector<8x4xbf16>, vector<8x4xbf16>, vector<8x8xf32> -> vector<8x8xf32>
    %cst_73 = arith.constant 5.000000e-01 : f32
    %138 = vector.broadcast %cst_73 : f32 to vector<8x8xf32>
    %139 = arith.mulf %137, %138 : vector<8x8xf32>
    %cst_74 = arith.constant dense<0xFF800000> : vector<8xf32>
    %140 = vector.multi_reduction <maximumf>, %139, %cst_74 [1] : vector<8x8xf32> to vector<8xf32>
    %141 = vector.shape_cast %140 : vector<8xf32> to vector<8x1xf32>
    %142 = vector.broadcast %141 : vector<8x1xf32> to vector<8x8xf32>
    %143 = arith.subf %139, %142 : vector<8x8xf32>
    %144 = math.exp %143 : vector<8x8xf32>
    %cst_75 = arith.constant dense<0.000000e+00> : vector<8xf32>
    %145 = vector.multi_reduction <add>, %144, %cst_75 [1] : vector<8x8xf32> to vector<8xf32>
    %146 = vector.shape_cast %145 : vector<8xf32> to vector<8x1xf32>
    %147 = vector.broadcast %146 : vector<8x1xf32> to vector<8x8xf32>
    %148 = arith.divf %144, %147 : vector<8x8xf32>
    %149 = arith.truncf %148 : vector<8x8xf32> to vector<8x8xbf16>
    %cst_76 = arith.constant dense<0.000000e+00> : vector<8x4xf32>
    %150 = tpu.matmul %149, %136, %cst_76 {dimension_numbers = #tpu.dot_dimension_numbers<[1], [0], [0], [1], [0, 0, 1, 1], [], []>} : vector<8x8xbf16>, vector<8x4xbf16>, vector<8x4xf32> -> vector<8x4xf32>
    %151 = tpu.concatenate %133, %150 in 1 : vector<8x4xf32>, vector<8x4xf32> -> vector<8x8xf32>
    %152 = arith.truncf %151 : vector<8x8xf32> to vector<8x8xbf16>
    %c0_77 = arith.constant 0 : index
    %c24_78 = arith.constant 24 : index
    %153 = vector.load %arg7[%c0_77, %c24_78] : memref<8x32xbf16, #tpu.memory_space<vmem>>, vector<8x8xbf16>
    tpu.vector_store %arg7[%c0_77, %c24_78], %152 {strides = array<i32>} : memref<8x32xbf16, #tpu.memory_space<vmem>>, vector<8x8xbf16>,
    %c0_79 = arith.constant 0 : index
    %c0_80 = arith.constant 0 : index
    %154 = vector.load %arg7[%c0_79, %c0_80] : memref<8x32xbf16, #tpu.memory_space<vmem>>, vector<8x32xbf16>
    %c0_81 = arith.constant 0 : index
    %c0_82 = arith.constant 0 : index
    %155 = vector.load %arg3[%c0_81, %c0_82] : memref<32x32xbf16, #tpu.memory_space<vmem>>, vector<32x32xbf16>
    %cst_83 = arith.constant dense<0.000000e+00> : vector<8x32xf32>
    %156 = tpu.matmul %154, %155, %cst_83 {dimension_numbers = #tpu.dot_dimension_numbers<[1], [0], [0], [1], [0, 0, 1, 1], [], []>} : vector<8x32xbf16>, vector<32x32xbf16>, vector<8x32xf32> -> vector<8x32xf32>
    %c0_84 = arith.constant 0 : index
    %c0_85 = arith.constant 0 : index
    %157 = vector.load %arg4[%c0_84, %c0_85] : memref<1x32xbf16, #tpu.memory_space<vmem>>, vector<1x32xbf16>
    %158 = arith.extf %157 : vector<1x32xbf16> to vector<1x32xf32>
    %159 = vector.broadcast %158 : vector<1x32xf32> to vector<8x32xf32>
    %160 = arith.addf %156, %159 : vector<8x32xf32>
    %161 = arith.truncf %160 : vector<8x32xf32> to vector<8x32xbf16>
    %c0_86 = arith.constant 0 : index
    %c0_87 = arith.constant 0 : index
    %c0_88 = arith.constant 0 : index
    %162 = vector.load %arg5[%c0_86, %c0_87, %c0_88] : memref<2x8x32xbf16, #tpu.memory_space<vmem>>, vector<1x8x32xbf16>
    %163 = vector.shape_cast %162 : vector<1x8x32xbf16> to vector<8x32xbf16>
    %164 = vector.shape_cast %161 : vector<8x32xbf16> to vector<1x8x32xbf16>
    tpu.vector_store %arg5[%c0_86, %c0_87, %c0_88], %164 {strides = array<i32>} : memref<2x8x32xbf16, #tpu.memory_space<vmem>>, vector<1x8x32xbf16>,
    %c1 = arith.constant 1 : index
    %c0_89 = arith.constant 0 : index
    %c0_90 = arith.constant 0 : index
    %165 = vector.load %arg1[%c1, %c0_89, %c0_90] : memref<2x8x32xbf16, #tpu.memory_space<vmem>>, vector<1x8x32xbf16>
    %166 = vector.shape_cast %165 : vector<1x8x32xbf16> to vector<8x32xbf16>
    %c0_91 = arith.constant 0 : index
    %c0_92 = arith.constant 0 : index
    %167 = vector.load %arg2[%c0_91, %c0_92] : memref<32x96xbf16, #tpu.memory_space<vmem>>, vector<32x96xbf16>
    %cst_93 = arith.constant dense<0.000000e+00> : vector<8x96xf32>
    %168 = tpu.matmul %166, %167, %cst_93 {dimension_numbers = #tpu.dot_dimension_numbers<[1], [0], [0], [1], [0, 0, 1, 1], [], []>} : vector<8x32xbf16>, vector<32x96xbf16>, vector<8x96xf32> -> vector<8x96xf32>
    %169 = arith.truncf %168 : vector<8x96xf32> to vector<8x96xbf16>
    %c0_94 = arith.constant 0 : index
    %c0_95 = arith.constant 0 : index
    %170 = vector.load %arg6[%c0_94, %c0_95] : memref<8x96xbf16, #tpu.memory_space<vmem>>, vector<8x96xbf16>
    tpu.vector_store %arg6[%c0_94, %c0_95], %169 {strides = array<i32>} : memref<8x96xbf16, #tpu.memory_space<vmem>>, vector<8x96xbf16>,
    %c0_96 = arith.constant 0 : index
    %c0_97 = arith.constant 0 : index
    %171 = vector.load %arg6[%c0_96, %c0_97] : memref<8x96xbf16, #tpu.memory_space<vmem>>, vector<8x4xbf16>
    %c0_98 = arith.constant 0 : index
    %c32_99 = arith.constant 32 : index
    %172 = vector.load %arg6[%c0_98, %c32_99] : memref<8x96xbf16, #tpu.memory_space<vmem>>, vector<8x4xbf16>
    %c0_100 = arith.constant 0 : index
    %c64_101 = arith.constant 64 : index
    %173 = vector.load %arg6[%c0_100, %c64_101] : memref<8x96xbf16, #tpu.memory_space<vmem>>, vector<8x4xbf16>
    %cst_102 = arith.constant dense<0.000000e+00> : vector<8x8xf32>
    %174 = tpu.matmul %171, %172, %cst_102 {dimension_numbers = #tpu.dot_dimension_numbers<[1], [1], [0], [0], [0, 0, 1, 0], [], []>} : vector<8x4xbf16>, vector<8x4xbf16>, vector<8x8xf32> -> vector<8x8xf32>
    %cst_103 = arith.constant 5.000000e-01 : f32
    %175 = vector.broadcast %cst_103 : f32 to vector<8x8xf32>
    %176 = arith.mulf %174, %175 : vector<8x8xf32>
    %cst_104 = arith.constant dense<0xFF800000> : vector<8xf32>
    %177 = vector.multi_reduction <maximumf>, %176, %cst_104 [1] : vector<8x8xf32> to vector<8xf32>
    %178 = vector.shape_cast %177 : vector<8xf32> to vector<8x1xf32>
    %179 = vector.broadcast %178 : vector<8x1xf32> to vector<8x8xf32>
    %180 = arith.subf %176, %179 : vector<8x8xf32>
    %181 = math.exp %180 : vector<8x8xf32>
    %cst_105 = arith.constant dense<0.000000e+00> : vector<8xf32>
    %182 = vector.multi_reduction <add>, %181, %cst_105 [1] : vector<8x8xf32> to vector<8xf32>
    %183 = vector.shape_cast %182 : vector<8xf32> to vector<8x1xf32>
    %184 = vector.broadcast %183 : vector<8x1xf32> to vector<8x8xf32>
    %185 = arith.divf %181, %184 : vector<8x8xf32>
    %186 = arith.truncf %185 : vector<8x8xf32> to vector<8x8xbf16>
    %cst_106 = arith.constant dense<0.000000e+00> : vector<8x4xf32>
    %187 = tpu.matmul %186, %173, %cst_106 {dimension_numbers = #tpu.dot_dimension_numbers<[1], [0], [0], [1], [0, 0, 1, 1], [], []>} : vector<8x8xbf16>, vector<8x4xbf16>, vector<8x4xf32> -> vector<8x4xf32>
    %c0_107 = arith.constant 0 : index
    %c4_108 = arith.constant 4 : index
    %188 = vector.load %arg6[%c0_107, %c4_108] : memref<8x96xbf16, #tpu.memory_space<vmem>>, vector<8x4xbf16>
    %c0_109 = arith.constant 0 : index
    %c36_110 = arith.constant 36 : index
    %189 = vector.load %arg6[%c0_109, %c36_110] : memref<8x96xbf16, #tpu.memory_space<vmem>>, vector<8x4xbf16>
    %c0_111 = arith.constant 0 : index
    %c68_112 = arith.constant 68 : index
    %190 = vector.load %arg6[%c0_111, %c68_112] : memref<8x96xbf16, #tpu.memory_space<vmem>>, vector<8x4xbf16>
    %cst_113 = arith.constant dense<0.000000e+00> : vector<8x8xf32>
    %191 = tpu.matmul %188, %189, %cst_113 {dimension_numbers = #tpu.dot_dimension_numbers<[1], [1], [0], [0], [0, 0, 1, 0], [], []>} : vector<8x4xbf16>, vector<8x4xbf16>, vector<8x8xf32> -> vector<8x8xf32>
    %cst_114 = arith.constant 5.000000e-01 : f32
    %192 = vector.broadcast %cst_114 : f32 to vector<8x8xf32>
    %193 = arith.mulf %191, %192 : vector<8x8xf32>
    %cst_115 = arith.constant dense<0xFF800000> : vector<8xf32>
    %194 = vector.multi_reduction <maximumf>, %193, %cst_115 [1] : vector<8x8xf32> to vector<8xf32>
    %195 = vector.shape_cast %194 : vector<8xf32> to vector<8x1xf32>
    %196 = vector.broadcast %195 : vector<8x1xf32> to vector<8x8xf32>
    %197 = arith.subf %193, %196 : vector<8x8xf32>
    %198 = math.exp %197 : vector<8x8xf32>
    %cst_116 = arith.constant dense<0.000000e+00> : vector<8xf32>
    %199 = vector.multi_reduction <add>, %198, %cst_116 [1] : vector<8x8xf32> to vector<8xf32>
    %200 = vector.shape_cast %199 : vector<8xf32> to vector<8x1xf32>
    %201 = vector.broadcast %200 : vector<8x1xf32> to vector<8x8xf32>
    %202 = arith.divf %198, %201 : vector<8x8xf32>
    %203 = arith.truncf %202 : vector<8x8xf32> to vector<8x8xbf16>
    %cst_117 = arith.constant dense<0.000000e+00> : vector<8x4xf32>
    %204 = tpu.matmul %203, %190, %cst_117 {dimension_numbers = #tpu.dot_dimension_numbers<[1], [0], [0], [1], [0, 0, 1, 1], [], []>} : vector<8x8xbf16>, vector<8x4xbf16>, vector<8x4xf32> -> vector<8x4xf32>
    %205 = tpu.concatenate %187, %204 in 1 : vector<8x4xf32>, vector<8x4xf32> -> vector<8x8xf32>
    %206 = arith.truncf %205 : vector<8x8xf32> to vector<8x8xbf16>
    %c0_118 = arith.constant 0 : index
    %c0_119 = arith.constant 0 : index
    %207 = vector.load %arg7[%c0_118, %c0_119] : memref<8x32xbf16, #tpu.memory_space<vmem>>, vector<8x8xbf16>
    tpu.vector_store %arg7[%c0_118, %c0_119], %206 {strides = array<i32>} : memref<8x32xbf16, #tpu.memory_space<vmem>>, vector<8x8xbf16>,
    %c0_120 = arith.constant 0 : index
    %c8_121 = arith.constant 8 : index
    %208 = vector.load %arg6[%c0_120, %c8_121] : memref<8x96xbf16, #tpu.memory_space<vmem>>, vector<8x4xbf16>
    %c0_122 = arith.constant 0 : index
    %c40_123 = arith.constant 40 : index
    %209 = vector.load %arg6[%c0_122, %c40_123] : memref<8x96xbf16, #tpu.memory_space<vmem>>, vector<8x4xbf16>
    %c0_124 = arith.constant 0 : index
    %c72_125 = arith.constant 72 : index
    %210 = vector.load %arg6[%c0_124, %c72_125] : memref<8x96xbf16, #tpu.memory_space<vmem>>, vector<8x4xbf16>
    %cst_126 = arith.constant dense<0.000000e+00> : vector<8x8xf32>
    %211 = tpu.matmul %208, %209, %cst_126 {dimension_numbers = #tpu.dot_dimension_numbers<[1], [1], [0], [0], [0, 0, 1, 0], [], []>} : vector<8x4xbf16>, vector<8x4xbf16>, vector<8x8xf32> -> vector<8x8xf32>
    %cst_127 = arith.constant 5.000000e-01 : f32
    %212 = vector.broadcast %cst_127 : f32 to vector<8x8xf32>
    %213 = arith.mulf %211, %212 : vector<8x8xf32>
    %cst_128 = arith.constant dense<0xFF800000> : vector<8xf32>
    %214 = vector.multi_reduction <maximumf>, %213, %cst_128 [1] : vector<8x8xf32> to vector<8xf32>
    %215 = vector.shape_cast %214 : vector<8xf32> to vector<8x1xf32>
    %216 = vector.broadcast %215 : vector<8x1xf32> to vector<8x8xf32>
    %217 = arith.subf %213, %216 : vector<8x8xf32>
    %218 = math.exp %217 : vector<8x8xf32>
    %cst_129 = arith.constant dense<0.000000e+00> : vector<8xf32>
    %219 = vector.multi_reduction <add>, %218, %cst_129 [1] : vector<8x8xf32> to vector<8xf32>
    %220 = vector.shape_cast %219 : vector<8xf32> to vector<8x1xf32>
    %221 = vector.broadcast %220 : vector<8x1xf32> to vector<8x8xf32>
    %222 = arith.divf %218, %221 : vector<8x8xf32>
    %223 = arith.truncf %222 : vector<8x8xf32> to vector<8x8xbf16>
    %cst_130 = arith.constant dense<0.000000e+00> : vector<8x4xf32>
    %224 = tpu.matmul %223, %210, %cst_130 {dimension_numbers = #tpu.dot_dimension_numbers<[1], [0], [0], [1], [0, 0, 1, 1], [], []>} : vector<8x8xbf16>, vector<8x4xbf16>, vector<8x4xf32> -> vector<8x4xf32>
    %c0_131 = arith.constant 0 : index
    %c12_132 = arith.constant 12 : index
    %225 = vector.load %arg6[%c0_131, %c12_132] : memref<8x96xbf16, #tpu.memory_space<vmem>>, vector<8x4xbf16>
    %c0_133 = arith.constant 0 : index
    %c44_134 = arith.constant 44 : index
    %226 = vector.load %arg6[%c0_133, %c44_134] : memref<8x96xbf16, #tpu.memory_space<vmem>>, vector<8x4xbf16>
    %c0_135 = arith.constant 0 : index
    %c76_136 = arith.constant 76 : index
    %227 = vector.load %arg6[%c0_135, %c76_136] : memref<8x96xbf16, #tpu.memory_space<vmem>>, vector<8x4xbf16>
    %cst_137 = arith.constant dense<0.000000e+00> : vector<8x8xf32>
    %228 = tpu.matmul %225, %226, %cst_137 {dimension_numbers = #tpu.dot_dimension_numbers<[1], [1], [0], [0], [0, 0, 1, 0], [], []>} : vector<8x4xbf16>, vector<8x4xbf16>, vector<8x8xf32> -> vector<8x8xf32>
    %cst_138 = arith.constant 5.000000e-01 : f32
    %229 = vector.broadcast %cst_138 : f32 to vector<8x8xf32>
    %230 = arith.mulf %228, %229 : vector<8x8xf32>
    %cst_139 = arith.constant dense<0xFF800000> : vector<8xf32>
    %231 = vector.multi_reduction <maximumf>, %230, %cst_139 [1] : vector<8x8xf32> to vector<8xf32>
    %232 = vector.shape_cast %231 : vector<8xf32> to vector<8x1xf32>
    %233 = vector.broadcast %232 : vector<8x1xf32> to vector<8x8xf32>
    %234 = arith.subf %230, %233 : vector<8x8xf32>
    %235 = math.exp %234 : vector<8x8xf32>
    %cst_140 = arith.constant dense<0.000000e+00> : vector<8xf32>
    %236 = vector.multi_reduction <add>, %235, %cst_140 [1] : vector<8x8xf32> to vector<8xf32>
    %237 = vector.shape_cast %236 : vector<8xf32> to vector<8x1xf32>
    %238 = vector.broadcast %237 : vector<8x1xf32> to vector<8x8xf32>
    %239 = arith.divf %235, %238 : vector<8x8xf32>
    %240 = arith.truncf %239 : vector<8x8xf32> to vector<8x8xbf16>
    %cst_141 = arith.constant dense<0.000000e+00> : vector<8x4xf32>
    %241 = tpu.matmul %240, %227, %cst_141 {dimension_numbers = #tpu.dot_dimension_numbers<[1], [0], [0], [1], [0, 0, 1, 1], [], []>} : vector<8x8xbf16>, vector<8x4xbf16>, vector<8x4xf32> -> vector<8x4xf32>
    %242 = tpu.concatenate %224, %241 in 1 : vector<8x4xf32>, vector<8x4xf32> -> vector<8x8xf32>
    %243 = arith.truncf %242 : vector<8x8xf32> to vector<8x8xbf16>
    %c0_142 = arith.constant 0 : index
    %c8_143 = arith.constant 8 : index
    %244 = vector.load %arg7[%c0_142, %c8_143] : memref<8x32xbf16, #tpu.memory_space<vmem>>, vector<8x8xbf16>
    tpu.vector_store %arg7[%c0_142, %c8_143], %243 {strides = array<i32>} : memref<8x32xbf16, #tpu.memory_space<vmem>>, vector<8x8xbf16>,
    %c0_144 = arith.constant 0 : index
    %c16_145 = arith.constant 16 : index
    %245 = vector.load %arg6[%c0_144, %c16_145] : memref<8x96xbf16, #tpu.memory_space<vmem>>, vector<8x4xbf16>
    %c0_146 = arith.constant 0 : index
    %c48_147 = arith.constant 48 : index
    %246 = vector.load %arg6[%c0_146, %c48_147] : memref<8x96xbf16, #tpu.memory_space<vmem>>, vector<8x4xbf16>
    %c0_148 = arith.constant 0 : index
    %c80_149 = arith.constant 80 : index
    %247 = vector.load %arg6[%c0_148, %c80_149] : memref<8x96xbf16, #tpu.memory_space<vmem>>, vector<8x4xbf16>
    %cst_150 = arith.constant dense<0.000000e+00> : vector<8x8xf32>
    %248 = tpu.matmul %245, %246, %cst_150 {dimension_numbers = #tpu.dot_dimension_numbers<[1], [1], [0], [0], [0, 0, 1, 0], [], []>} : vector<8x4xbf16>, vector<8x4xbf16>, vector<8x8xf32> -> vector<8x8xf32>
    %cst_151 = arith.constant 5.000000e-01 : f32
    %249 = vector.broadcast %cst_151 : f32 to vector<8x8xf32>
    %250 = arith.mulf %248, %249 : vector<8x8xf32>
    %cst_152 = arith.constant dense<0xFF800000> : vector<8xf32>
    %251 = vector.multi_reduction <maximumf>, %250, %cst_152 [1] : vector<8x8xf32> to vector<8xf32>
    %252 = vector.shape_cast %251 : vector<8xf32> to vector<8x1xf32>
    %253 = vector.broadcast %252 : vector<8x1xf32> to vector<8x8xf32>
    %254 = arith.subf %250, %253 : vector<8x8xf32>
    %255 = math.exp %254 : vector<8x8xf32>
    %cst_153 = arith.constant dense<0.000000e+00> : vector<8xf32>
    %256 = vector.multi_reduction <add>, %255, %cst_153 [1] : vector<8x8xf32> to vector<8xf32>
    %257 = vector.shape_cast %256 : vector<8xf32> to vector<8x1xf32>
    %258 = vector.broadcast %257 : vector<8x1xf32> to vector<8x8xf32>
    %259 = arith.divf %255, %258 : vector<8x8xf32>
    %260 = arith.truncf %259 : vector<8x8xf32> to vector<8x8xbf16>
    %cst_154 = arith.constant dense<0.000000e+00> : vector<8x4xf32>
    %261 = tpu.matmul %260, %247, %cst_154 {dimension_numbers = #tpu.dot_dimension_numbers<[1], [0], [0], [1], [0, 0, 1, 1], [], []>} : vector<8x8xbf16>, vector<8x4xbf16>, vector<8x4xf32> -> vector<8x4xf32>
    %c0_155 = arith.constant 0 : index
    %c20_156 = arith.constant 20 : index
    %262 = vector.load %arg6[%c0_155, %c20_156] : memref<8x96xbf16, #tpu.memory_space<vmem>>, vector<8x4xbf16>
    %c0_157 = arith.constant 0 : index
    %c52_158 = arith.constant 52 : index
    %263 = vector.load %arg6[%c0_157, %c52_158] : memref<8x96xbf16, #tpu.memory_space<vmem>>, vector<8x4xbf16>
    %c0_159 = arith.constant 0 : index
    %c84_160 = arith.constant 84 : index
    %264 = vector.load %arg6[%c0_159, %c84_160] : memref<8x96xbf16, #tpu.memory_space<vmem>>, vector<8x4xbf16>
    %cst_161 = arith.constant dense<0.000000e+00> : vector<8x8xf32>
    %265 = tpu.matmul %262, %263, %cst_161 {dimension_numbers = #tpu.dot_dimension_numbers<[1], [1], [0], [0], [0, 0, 1, 0], [], []>} : vector<8x4xbf16>, vector<8x4xbf16>, vector<8x8xf32> -> vector<8x8xf32>
    %cst_162 = arith.constant 5.000000e-01 : f32
    %266 = vector.broadcast %cst_162 : f32 to vector<8x8xf32>
    %267 = arith.mulf %265, %266 : vector<8x8xf32>
    %cst_163 = arith.constant dense<0xFF800000> : vector<8xf32>
    %268 = vector.multi_reduction <maximumf>, %267, %cst_163 [1] : vector<8x8xf32> to vector<8xf32>
    %269 = vector.shape_cast %268 : vector<8xf32> to vector<8x1xf32>
    %270 = vector.broadcast %269 : vector<8x1xf32> to vector<8x8xf32>
    %271 = arith.subf %267, %270 : vector<8x8xf32>
    %272 = math.exp %271 : vector<8x8xf32>
    %cst_164 = arith.constant dense<0.000000e+00> : vector<8xf32>
    %273 = vector.multi_reduction <add>, %272, %cst_164 [1] : vector<8x8xf32> to vector<8xf32>
    %274 = vector.shape_cast %273 : vector<8xf32> to vector<8x1xf32>
    %275 = vector.broadcast %274 : vector<8x1xf32> to vector<8x8xf32>
    %276 = arith.divf %272, %275 : vector<8x8xf32>
    %277 = arith.truncf %276 : vector<8x8xf32> to vector<8x8xbf16>
    %cst_165 = arith.constant dense<0.000000e+00> : vector<8x4xf32>
    %278 = tpu.matmul %277, %264, %cst_165 {dimension_numbers = #tpu.dot_dimension_numbers<[1], [0], [0], [1], [0, 0, 1, 1], [], []>} : vector<8x8xbf16>, vector<8x4xbf16>, vector<8x4xf32> -> vector<8x4xf32>
    %279 = tpu.concatenate %261, %278 in 1 : vector<8x4xf32>, vector<8x4xf32> -> vector<8x8xf32>
    %280 = arith.truncf %279 : vector<8x8xf32> to vector<8x8xbf16>
    %c0_166 = arith.constant 0 : index
    %c16_167 = arith.constant 16 : index
    %281 = vector.load %arg7[%c0_166, %c16_167] : memref<8x32xbf16, #tpu.memory_space<vmem>>, vector<8x8xbf16>
    tpu.vector_store %arg7[%c0_166, %c16_167], %280 {strides = array<i32>} : memref<8x32xbf16, #tpu.memory_space<vmem>>, vector<8x8xbf16>,
    %c0_168 = arith.constant 0 : index
    %c24_169 = arith.constant 24 : index
    %282 = vector.load %arg6[%c0_168, %c24_169] : memref<8x96xbf16, #tpu.memory_space<vmem>>, vector<8x4xbf16>
    %c0_170 = arith.constant 0 : index
    %c56_171 = arith.constant 56 : index
    %283 = vector.load %arg6[%c0_170, %c56_171] : memref<8x96xbf16, #tpu.memory_space<vmem>>, vector<8x4xbf16>
    %c0_172 = arith.constant 0 : index
    %c88_173 = arith.constant 88 : index
    %284 = vector.load %arg6[%c0_172, %c88_173] : memref<8x96xbf16, #tpu.memory_space<vmem>>, vector<8x4xbf16>
    %cst_174 = arith.constant dense<0.000000e+00> : vector<8x8xf32>
    %285 = tpu.matmul %282, %283, %cst_174 {dimension_numbers = #tpu.dot_dimension_numbers<[1], [1], [0], [0], [0, 0, 1, 0], [], []>} : vector<8x4xbf16>, vector<8x4xbf16>, vector<8x8xf32> -> vector<8x8xf32>
    %cst_175 = arith.constant 5.000000e-01 : f32
    %286 = vector.broadcast %cst_175 : f32 to vector<8x8xf32>
    %287 = arith.mulf %285, %286 : vector<8x8xf32>
    %cst_176 = arith.constant dense<0xFF800000> : vector<8xf32>
    %288 = vector.multi_reduction <maximumf>, %287, %cst_176 [1] : vector<8x8xf32> to vector<8xf32>
    %289 = vector.shape_cast %288 : vector<8xf32> to vector<8x1xf32>
    %290 = vector.broadcast %289 : vector<8x1xf32> to vector<8x8xf32>
    %291 = arith.subf %287, %290 : vector<8x8xf32>
    %292 = math.exp %291 : vector<8x8xf32>
    %cst_177 = arith.constant dense<0.000000e+00> : vector<8xf32>
    %293 = vector.multi_reduction <add>, %292, %cst_177 [1] : vector<8x8xf32> to vector<8xf32>
    %294 = vector.shape_cast %293 : vector<8xf32> to vector<8x1xf32>
    %295 = vector.broadcast %294 : vector<8x1xf32> to vector<8x8xf32>
    %296 = arith.divf %292, %295 : vector<8x8xf32>
    %297 = arith.truncf %296 : vector<8x8xf32> to vector<8x8xbf16>
    %cst_178 = arith.constant dense<0.000000e+00> : vector<8x4xf32>
    %298 = tpu.matmul %297, %284, %cst_178 {dimension_numbers = #tpu.dot_dimension_numbers<[1], [0], [0], [1], [0, 0, 1, 1], [], []>} : vector<8x8xbf16>, vector<8x4xbf16>, vector<8x4xf32> -> vector<8x4xf32>
    %c0_179 = arith.constant 0 : index
    %c28_180 = arith.constant 28 : index
    %299 = vector.load %arg6[%c0_179, %c28_180] : memref<8x96xbf16, #tpu.memory_space<vmem>>, vector<8x4xbf16>
    %c0_181 = arith.constant 0 : index
    %c60_182 = arith.constant 60 : index
    %300 = vector.load %arg6[%c0_181, %c60_182] : memref<8x96xbf16, #tpu.memory_space<vmem>>, vector<8x4xbf16>
    %c0_183 = arith.constant 0 : index
    %c92_184 = arith.constant 92 : index
    %301 = vector.load %arg6[%c0_183, %c92_184] : memref<8x96xbf16, #tpu.memory_space<vmem>>, vector<8x4xbf16>
    %cst_185 = arith.constant dense<0.000000e+00> : vector<8x8xf32>
    %302 = tpu.matmul %299, %300, %cst_185 {dimension_numbers = #tpu.dot_dimension_numbers<[1], [1], [0], [0], [0, 0, 1, 0], [], []>} : vector<8x4xbf16>, vector<8x4xbf16>, vector<8x8xf32> -> vector<8x8xf32>
    %cst_186 = arith.constant 5.000000e-01 : f32
    %303 = vector.broadcast %cst_186 : f32 to vector<8x8xf32>
    %304 = arith.mulf %302, %303 : vector<8x8xf32>
    %cst_187 = arith.constant dense<0xFF800000> : vector<8xf32>
    %305 = vector.multi_reduction <maximumf>, %304, %cst_187 [1] : vector<8x8xf32> to vector<8xf32>
    %306 = vector.shape_cast %305 : vector<8xf32> to vector<8x1xf32>
    %307 = vector.broadcast %306 : vector<8x1xf32> to vector<8x8xf32>
    %308 = arith.subf %304, %307 : vector<8x8xf32>
    %309 = math.exp %308 : vector<8x8xf32>
    %cst_188 = arith.constant dense<0.000000e+00> : vector<8xf32>
    %310 = vector.multi_reduction <add>, %309, %cst_188 [1] : vector<8x8xf32> to vector<8xf32>
    %311 = vector.shape_cast %310 : vector<8xf32> to vector<8x1xf32>
    %312 = vector.broadcast %311 : vector<8x1xf32> to vector<8x8xf32>
    %313 = arith.divf %309, %312 : vector<8x8xf32>
    %314 = arith.truncf %313 : vector<8x8xf32> to vector<8x8xbf16>
    %cst_189 = arith.constant dense<0.000000e+00> : vector<8x4xf32>
    %315 = tpu.matmul %314, %301, %cst_189 {dimension_numbers = #tpu.dot_dimension_numbers<[1], [0], [0], [1], [0, 0, 1, 1], [], []>} : vector<8x8xbf16>, vector<8x4xbf16>, vector<8x4xf32> -> vector<8x4xf32>
    %316 = tpu.concatenate %298, %315 in 1 : vector<8x4xf32>, vector<8x4xf32> -> vector<8x8xf32>
    %317 = arith.truncf %316 : vector<8x8xf32> to vector<8x8xbf16>
    %c0_190 = arith.constant 0 : index
    %c24_191 = arith.constant 24 : index
    %318 = vector.load %arg7[%c0_190, %c24_191] : memref<8x32xbf16, #tpu.memory_space<vmem>>, vector<8x8xbf16>
    tpu.vector_store %arg7[%c0_190, %c24_191], %317 {strides = array<i32>} : memref<8x32xbf16, #tpu.memory_space<vmem>>, vector<8x8xbf16>,
    %c0_192 = arith.constant 0 : index
    %c0_193 = arith.constant 0 : index
    %319 = vector.load %arg7[%c0_192, %c0_193] : memref<8x32xbf16, #tpu.memory_space<vmem>>, vector<8x32xbf16>
    %c0_194 = arith.constant 0 : index
    %c0_195 = arith.constant 0 : index
    %320 = vector.load %arg3[%c0_194, %c0_195] : memref<32x32xbf16, #tpu.memory_space<vmem>>, vector<32x32xbf16>
    %cst_196 = arith.constant dense<0.000000e+00> : vector<8x32xf32>
    %321 = tpu.matmul %319, %320, %cst_196 {dimension_numbers = #tpu.dot_dimension_numbers<[1], [0], [0], [1], [0, 0, 1, 1], [], []>} : vector<8x32xbf16>, vector<32x32xbf16>, vector<8x32xf32> -> vector<8x32xf32>
    %c0_197 = arith.constant 0 : index
    %c0_198 = arith.constant 0 : index
    %322 = vector.load %arg4[%c0_197, %c0_198] : memref<1x32xbf16, #tpu.memory_space<vmem>>, vector<1x32xbf16>
    %323 = arith.extf %322 : vector<1x32xbf16> to vector<1x32xf32>
    %324 = vector.broadcast %323 : vector<1x32xf32> to vector<8x32xf32>
    %325 = arith.addf %321, %324 : vector<8x32xf32>
    %326 = arith.truncf %325 : vector<8x32xf32> to vector<8x32xbf16>
    %c1_199 = arith.constant 1 : index
    %c0_200 = arith.constant 0 : index
    %c0_201 = arith.constant 0 : index
    %327 = vector.load %arg5[%c1_199, %c0_200, %c0_201] : memref<2x8x32xbf16, #tpu.memory_space<vmem>>, vector<1x8x32xbf16>
    %328 = vector.shape_cast %327 : vector<1x8x32xbf16> to vector<8x32xbf16>
    %329 = vector.shape_cast %326 : vector<8x32xbf16> to vector<1x8x32xbf16>
    tpu.vector_store %arg5[%c1_199, %c0_200, %c0_201], %329 {strides = array<i32>} : memref<2x8x32xbf16, #tpu.memory_space<vmem>>, vector<1x8x32xbf16>,
    return
  }
  func.func @transform_0(%arg0: i32) -> (i32, i32, i32) {
    %c0_i32 = arith.constant 0 : i32
    %c0_i32_0 = arith.constant 0 : i32
    %c0_i32_1 = arith.constant 0 : i32
    return %arg0, %c0_i32, %c0_i32_0 : i32, i32, i32
  }
  func.func @transform_1(%arg0: i32) -> (i32, i32) {
    %c0_i32 = arith.constant 0 : i32
    %c0_i32_0 = arith.constant 0 : i32
    %c0_i32_1 = arith.constant 0 : i32
    return %c0_i32, %c0_i32_0 : i32, i32
  }
  func.func @transform_2(%arg0: i32) -> (i32, i32) {
    %c0_i32 = arith.constant 0 : i32
    %c0_i32_0 = arith.constant 0 : i32
    %c0_i32_1 = arith.constant 0 : i32
    return %c0_i32, %c0_i32_0 : i32, i32
  }
  func.func @transform_3(%arg0: i32) -> (i32, i32) {
    %c0_i32 = arith.constant 0 : i32
    %c0_i32_0 = arith.constant 0 : i32
    %c0_i32_1 = arith.constant 0 : i32
    return %c0_i32, %c0_i32_0 : i32, i32
  }
  func.func @transform_4(%arg0: i32) -> (i32, i32, i32) {
    %c0_i32 = arith.constant 0 : i32
    %c0_i32_0 = arith.constant 0 : i32
    %c0_i32_1 = arith.constant 0 : i32
    return %arg0, %c0_i32, %c0_i32_0 : i32, i32, i32
  }
}

</mosaic_0001>

<bundles_post_ra>
// kernel: tpu_custom_call.1
= control target key start
LH: loop header
LB: loop body
LE: loop exit
PB: predicated region body
PF: predicated region fallthrough
CT: control target
= control target key end

     0   :  { %9 = vsyncpa [#allocation5], 0  ;;  %s3393_s0 = inlined_call_operand.hbm [shape: bf16[2,8,32], index: 0, kind: input, shape index: {}]   ;;  %s3394_s1 = inlined_call_operand.hbm [shape: bf16[32,96], index: 1, kind: input, shape index: {}]   ;;  %s3395_s2 = inlined_call_operand.hbm [shape: bf16[32,32], index: 2, kind: input, shape index: {}]   ;;  %s3396_s3 = inlined_call_operand.vmem [shape: bf16[1,32], index: 3, kind: input, shape index: {}]   ;;  %s3397_s4 = inlined_call_operand.hbm [shape: bf16[2,8,32], index: 4, kind: output, shape index: {}]  }
   0x1   :  { %10 = vsyncpa [#allocation8], 0 }
   0x2   :  { %11 = vsyncpa [#allocation6], 0  ;;  %s2827_s15 = smov [#allocation7]   ;;  %s2828_s17 = smov [#allocation4]  }
   0x3   :  { %s29_s16 = sshll.u32 %s2827_s15, 4  ;;  %s17_s18 = sshll.u32 %s2828_s17, 4  ;;  %s30_s16 = int_to_ptr.vmem [resolvable:$true] %s29_s16  ;;  %s2885_s18 = int_to_ptr.vmem [resolvable:$true] %s17_s18 }
   0x4   :  { %s2733_s21 = scalar_lea.hbm %s3394_s1, 256 }
   0x5   :  { %p2734_p0 = scmp.ne.s32.totalorder %s3394_s1, %s2733_s21  ;;  %p2737_p1 = scmp.lt.u32.totalorder %s2733_s21, %s3394_s1 }
   0x7   :  { %p2739_p2 = pnand %p2737_p1, %p2734_p0 }
   0x9   :  { %2742 = shalt.err (!%p2739_p2)
}
   0xa   :  { %s2743_s26 = scalar_lea.vmem %s30_s16, 256  ;;  %p2748_p4 = scmp.lt.s32.totalorder %s30_s16, %s30_s16 }
   0xb   :  { %p2744_p3 = scmp.ne.s32.totalorder %s30_s16, %s2743_s26  ;;  %p2749_p5 = scmp.lt.s32.totalorder %s2743_s26, %s2743_s26 }
   0xd   :  { %p2750_p6 = por %p2749_p5, %p2748_p4 }
   0xf   :  { %p2751_p7 = pnand %p2750_p6, %p2744_p3 }
  0x11   :  { %2754 = shalt.err (!%p2751_p7)
}
  0x12   :  { %s2829_s27 = smov 64   ;;  %s2830_s28 = smov 4  }
  0x13   :  { %35 = dma.hbm_to_vmem [thread:$0]  %s3394_s1, 256, %s30_s16, [#allocation8], %s2829_s27, %s2829_s27, %s2830_s28  }
  0x14   :  { %s2755_s7 = scalar_lea.hbm %s3393_s0, 128 }
  0x15   :  { %p2756_p8 = scmp.ne.s32.totalorder %s3393_s0, %s2755_s7  ;;  %p2759_p9 = scmp.lt.u32.totalorder %s2755_s7, %s3393_s0 }
  0x17   :  { %p2761_p10 = pnand %p2759_p9, %p2756_p8 }
  0x19   :  { %2764 = shalt.err (!%p2761_p10)
}
  0x1a   :  { %s2765_s12 = scalar_lea.vmem %s2885_s18, 128  ;;  %p2770_p12 = scmp.lt.s32.totalorder %s2885_s18, %s2885_s18 }
  0x1b   :  { %p2766_p11 = scmp.ne.s32.totalorder %s2885_s18, %s2765_s12  ;;  %p2771_p13 = scmp.lt.s32.totalorder %s2765_s12, %s2765_s12 }
  0x1d   :  { %p2772_p0 = por %p2771_p13, %p2770_p12 }
  0x1f   :  { %p2773_p1 = pnand %p2772_p0, %p2766_p11 }
  0x21   :  { %2776 = shalt.err (!%p2773_p1)
}
  0x22   :  { %23 = dma.hbm_to_vmem [thread:$0]  %s3393_s0, 128, %s2885_s18, [#allocation5], %s2829_s27, %s2829_s27, %s2830_s28  }
  0x23   :  { %s2831_s14 = smov [#allocation9]   ;;  %s2777_s19 = scalar_lea.hbm %s3395_s2, 256 }
  0x24   :  { %s41_s15 = sshll.u32 %s2831_s14, 4  ;;  %p2778_p2 = scmp.ne.s32.totalorder %s3395_s2, %s2777_s19  ;;  %s42_s15 = int_to_ptr.vmem [resolvable:$true] %s41_s15 }
  0x25   :  { %p2781_p3 = scmp.lt.u32.totalorder %s2777_s19, %s3395_s2 }
  0x27   :  { %p2783_p4 = pnand %p2781_p3, %p2778_p2 }
  0x29   :  { %2786 = shalt.err (!%p2783_p4)
}
  0x2a   :  { %s2787_s24 = scalar_lea.vmem %s42_s15, 256  ;;  %p2792_p6 = scmp.lt.s32.totalorder %s42_s15, %s42_s15 }
  0x2b   :  { %p2788_p5 = scmp.ne.s32.totalorder %s42_s15, %s2787_s24  ;;  %p2793_p7 = scmp.lt.s32.totalorder %s2787_s24, %s2787_s24 }
  0x2d   :  { %p2794_p8 = por %p2793_p7, %p2792_p6 }
  0x2f   :  { %p2795_p9 = pnand %p2794_p8, %p2788_p5 }
  0x31   :  { %2798 = shalt.err (!%p2795_p9)
}
  0x32   :  { %47 = dma.hbm_to_vmem [thread:$0]  %s3395_s2, 256, %s42_s15, [#allocation8], %s2829_s27, %s2829_s27, %s2830_s28  }
  0x33   :  { %2821 = dma.done.wait [#allocation5], 128  }
  0x34   :  { %2822 = vsyncadd [#allocation5], 4294967168 }
  0x35   :  { %2823 = dma.done.wait [#allocation8], 512  }
  0x36   :  { %2824 = vsyncadd [#allocation8], 4294966784  ;;  %v2832_v0 = vmov 0.0   ;;  %vm2833_vm0 = vmmov 0   ;;  %v2653_v1 = vld [vmem:[#allocation7] sm:$0xff]   ;;  %v2654_v2 = vld [vmem:[#allocation7 + $0x8] sm:$0xff]  }
  0x37   :  { %2386 = vmatprep.subr.bf16.mxu0 %v2832_v0  ;;  %2390 = vmatprep.mubr.msk.bf16.mxu0 %vm2833_vm0, %v2832_v0  ;;  %v60_v3 = vld [vmem:[#allocation4] sm:$0xf]  ;;  %vm77_vm1 = vcmask 261120   ;;  %vm122_vm2 = vcmask 781312   ;;  %s2834_s2 = smov 124   ;;  %s2835_s25 = smov 96  }
  0x38   :  { %2394 = vmatprep.subr.bf16.mxu1 %v2832_v0  ;;  %2396 = vmatprep.mubr.msk.bf16.mxu1 %vm2833_vm0, %v2832_v0  ;;  %s2836_s26 = smov 88   ;;  %s2837_s29 = smov 92   ;;  %vm130_vm3 = vcmask 31744   ;;  %vm178_vm4 = vcmask 64512   ;;  %vm196_vm5 = vcmask 1043456   ;;  %vm357_vm6 = vcmask 60416  }
  0x39   :  { %2387 = vmatpush3.bf16.msra.mxu0 %v2653_v1  ;;  %s2838_s30 = smov 84   ;;  %s2839_s5 = smov 120   ;;  %vm597_vm7 = vcmask 126016   ;;  %vm837_vm8 = vcmask 191616   ;;  %vm1077_vm9 = vcmask 257216   ;;  %vm1146_vm10 = vcmask 257024  }
  0x3a   :  { %2388 = vmatprep.subr.bf16.mxu0 %v2832_v0  ;;  %s2840_s6 = smov 80   ;;  %s2841_s7 = smov 116  }
  0x3b   :  { %s2842_s8 = smov 76   ;;  %s2843_s9 = smov 112  }
  0x3c   :  { %s2844_s10 = smov 72   ;;  %s2845_s11 = smov 108  }
  0x3d   :  { %2389 = vmatpush3.bf16.msra.mxu0 %v2654_v2  ;;  %s2846_s12 = smov 68   ;;  %s2847_s1 = smov 104  }
  0x3e   :  { %2400 = vmatprep.subr.bf16.mxu0 %v2832_v0  ;;  %s2848_s13 = smov 100   ;;  %s2849_s14 = smov 60  }
  0x3f   :  { %s2850_s15 = smov 56   ;;  %s2851_s16 = smov 52  }
  0x40   :  { %2391 = vmatmul.mubr.msk.bf16.vlgmr.msra.gmra.mrb[0].mxu0 %vm77_vm1, %v60_v3  ;;  %s2852_s17 = smov 44   ;;  %s2853_s19 = smov 40  }
  0x41   :  { %2402 = vmatprep.mubr.msk.bf16.mxu0 %vm2833_vm0, %v2832_v0  ;;  %s2854_s20 = smov 36   ;;  %s2855_s21 = smov 48  }
  0x42   :  { %s2856_s22 = smov 16   ;;  %s2857_s23 = smov 8  }
  0x43   :  { %s2858_s24 = smov 24  }
 0x113   :  { %v115_v4 = vpop.f32.mrb[0].mxu0 }
 0x114   :  { %v121_v5 = vpack.c.bf16 %v115_v4, %v115_v4  ;;  %v2392_v6 = vpop.f32.mrb[1].mxu0 }
 0x115   :  { %v118_v7 = vpop.f32.mrb[2].mxu0 }
 0x116   :  { %123 = vst.msk [vmem:[#allocation2] sm:$0xf] %vm122_vm2, %v121_v5  ;;  %v2393_v8 = vpop.f32.mrb[3].mxu0 }
 0x11d   :  { %v124_v9 = vld [vmem:[#allocation2] sm:$0xf] }
 0x11e   :  { %v2949_v10 = vcombine.low %v124_v9, %v124_v9  ;;  %v2955_v11 = vld [vmem:[#allocation2] ss:$0 sps:$4 sm:$0xff]  }
 0x11f   :  { %v2965_v12 = vld [vmem:[#allocation2] ss:$0 sps:$4 sm:$0xff]  }
 0x120   :  { %240 = vrot.lane.b32.xlu1 %v2949_v10, %s2834_s2  ;;  %128 = vrot.lane.b32.xlu0 %v2949_v10, %s2835_s25  ;;  %v2975_v13 = vld [vmem:[#allocation2] ss:$0 sps:$4 sm:$0xff]  }
 0x124   :  { %365 = vrot.lane.b32.xlu1 %v2955_v11, %s2836_s26  ;;  %242 = vrot.lane.b32.xlu0 %v2949_v10, %s2837_s29 }
 0x128   :  { %476 = vrot.lane.b32.xlu1 %v2955_v11, %s2838_s30  ;;  %363 = vrot.lane.b32.xlu0 %v2955_v11, %s2839_s5 }
 0x12c   :  { %605 = vrot.lane.b32.xlu1 %v2965_v12, %s2840_s6  ;;  %474 = vrot.lane.b32.xlu0 %v2955_v11, %s2841_s7 }
 0x130   :  { %716 = vrot.lane.b32.xlu1 %v2965_v12, %s2842_s8  ;;  %603 = vrot.lane.b32.xlu0 %v2965_v12, %s2843_s9 }
 0x134   :  { %845 = vrot.lane.b32.xlu1 %v2975_v13, %s2844_s10  ;;  %714 = vrot.lane.b32.xlu0 %v2965_v12, %s2845_s11 }
 0x138   :  { %956 = vrot.lane.b32.xlu1 %v2975_v13, %s2846_s12  ;;  %843 = vrot.lane.b32.xlu0 %v2975_v13, %s2847_s1 }
 0x13c   :  { %954 = vrot.lane.b32.xlu0 %v2975_v13, %s2848_s13 }
 0x192   :  { %v129_v14 = vpop.permute.xlu0 %128  ;;  %v241_v17 = vpop.permute.xlu1 %240 }
 0x193   :  { %v135_v15 = vsel %vm130_vm3, %v129_v14, 0 }
 0x194   :  { %2395 = vmatpush3.bf16.xpose.msra.mxu1 %v135_v15 }
 0x195   :  { %2406 = vmatprep.subr.bf16.mxu1 %v2832_v0 }
 0x196   :  { %v243_v16 = vpop.permute.xlu0 %242  ;;  %v366_v19 = vpop.permute.xlu1 %365 }
 0x197   :  { %v248_v18 = vsel %vm130_vm3, %v243_v16, 0  ;;  %v371_v20 = vsel %vm130_vm3, %v366_v19, 0 }
 0x19a   :  { %v477_v21 = vpop.permute.xlu1 %476  ;;  %v364_v22 = vpop.permute.xlu0 %363 }
 0x19b   :  { %2397 = vmatmul.mubr.msk.bf16.vlgmr.msra.gmra.mrb[0].mxu1 %vm130_vm3, %v124_v9  ;;  %v482_v23 = vsel %vm130_vm3, %v477_v21, 0 }
 0x19c   :  { %2407 = vmatpush3.bf16.xpose.msra.mxu1 %v248_v18  ;;  %2408 = vmatprep.mubr.msk.bf16.mxu1 %vm2833_vm0, %v2832_v0 }
 0x19d   :  { %2418 = vmatprep.subr.bf16.mxu1 %v2832_v0 }
 0x19e   :  { %v606_v24 = vpop.permute.xlu1 %605  ;;  %v475_v25 = vpop.permute.xlu0 %474 }
 0x19f   :  { %v611_v26 = vsel %vm130_vm3, %v606_v24, 0 }
 0x1a2   :  { %v717_v27 = vpop.permute.xlu1 %716  ;;  %v604_v28 = vpop.permute.xlu0 %603 }
 0x1a3   :  { %2409 = vmatmul.mubr.msk.bf16.vlgmr.msra.gmra.mrb[4].mxu1 %vm130_vm3, %v241_v17  ;;  %v722_v29 = vsel %vm130_vm3, %v717_v27, 0 }
 0x1a4   :  { %2419 = vmatpush3.bf16.xpose.msra.mxu1 %v371_v20  ;;  %2420 = vmatprep.mubr.msk.bf16.mxu1 %vm2833_vm0, %v2832_v0 }
 0x1a5   :  { %2430 = vmatprep.subr.bf16.mxu1 %v2832_v0 }
 0x1a6   :  { %v846_v30 = vpop.permute.xlu1 %845  ;;  %v715_v31 = vpop.permute.xlu0 %714 }
 0x1a7   :  { %v851_v32 = vsel %vm130_vm3, %v846_v30, 0 }
 0x1aa   :  { %v957_v33 = vpop.permute.xlu1 %956  ;;  %v844_v34 = vpop.permute.xlu0 %843 }
 0x1ab   :  { %2421 = vmatmul.mubr.msk.bf16.vlgmr.msra.gmra.mrb[8].mxu1 %vm130_vm3, %v364_v22  ;;  %v962_v35 = vsel %vm130_vm3, %v957_v33, 0 }
 0x1ac   :  { %2431 = vmatpush3.bf16.xpose.msra.mxu1 %v482_v23  ;;  %2432 = vmatprep.mubr.msk.bf16.mxu1 %vm2833_vm0, %v2832_v0 }
 0x1ad   :  { %2442 = vmatprep.subr.bf16.mxu1 %v2832_v0 }
 0x1ae   :  { %v955_v36 = vpop.permute.xlu0 %954 }
 0x1b3   :  { %2433 = vmatmul.mubr.msk.bf16.vlgmr.msra.gmra.mrb[12].mxu1 %vm130_vm3, %v475_v25 }
 0x1b4   :  { %2443 = vmatpush3.bf16.xpose.msra.mxu1 %v611_v26  ;;  %2444 = vmatprep.mubr.msk.bf16.mxu1 %vm2833_vm0, %v2832_v0 }
 0x1b5   :  { %2454 = vmatprep.subr.bf16.mxu1 %v2832_v0 }
 0x1bb   :  { %2445 = vmatmul.mubr.msk.bf16.vlgmr.msra.gmra.mrb[16].mxu1 %vm130_vm3, %v604_v28 }
 0x1bc   :  { %2455 = vmatpush3.bf16.xpose.msra.mxu1 %v722_v29  ;;  %2456 = vmatprep.mubr.msk.bf16.mxu1 %vm2833_vm0, %v2832_v0 }
 0x1bd   :  { %2466 = vmatprep.subr.bf16.mxu1 %v2832_v0 }
 0x1c3   :  { %2457 = vmatmul.mubr.msk.bf16.vlgmr.msra.gmra.mrb[20].mxu1 %vm130_vm3, %v715_v31 }
 0x1c4   :  { %2467 = vmatpush3.bf16.xpose.msra.mxu1 %v851_v32  ;;  %2468 = vmatprep.mubr.msk.bf16.mxu1 %vm2833_vm0, %v2832_v0 }
 0x1c5   :  { %2478 = vmatprep.subr.bf16.mxu1 %v2832_v0 }
 0x1cb   :  { %2469 = vmatmul.mubr.msk.bf16.vlgmr.msra.gmra.mrb[24].mxu1 %vm130_vm3, %v844_v34 }
 0x1cc   :  { %2479 = vmatpush3.bf16.xpose.msra.mxu1 %v962_v35  ;;  %2480 = vmatprep.mubr.msk.bf16.mxu1 %vm2833_vm0, %v2832_v0 }
 0x1cd   :  { %2490 = vmatprep.subr.bf16.mxu1 %v2832_v0 }
 0x1d3   :  { %2481 = vmatmul.mubr.msk.bf16.vlgmr.msra.gmra.mrb[28].mxu1 %vm130_vm3, %v955_v36 }
 0x1d4   :  { %2494 = vmatprep.mubr.msk.bf16.mxu1 %vm2833_vm0, %v2832_v0 }
 0x26e   :  { %v171_v37 = vpop.f32.mrb[0].mxu1 }
 0x26f   :  { %v177_v38 = vmul.f32 0.5, %v171_v37  ;;  %v2398_v39 = vpop.f32.mrb[1].mxu1 }
 0x270   :  { %v174_v40 = vpop.f32.mrb[2].mxu1 }
 0x271   :  { %v2399_v41 = vpop.f32.mrb[3].mxu1  ;;  %v179_v42 = vsel %vm178_vm4, %v177_v38, -inf }
 0x272   :  { %180 = vmax.xlane.f32.xlu1 %v179_v42 }
 0x276   :  { %v284_v43 = vpop.f32.mrb[4].mxu1 }
 0x277   :  { %v290_v44 = vmul.f32 0.5, %v284_v43  ;;  %v2410_v45 = vpop.f32.mrb[5].mxu1 }
 0x278   :  { %v287_v46 = vpop.f32.mrb[6].mxu1 }
 0x279   :  { %v2411_v47 = vpop.f32.mrb[7].mxu1  ;;  %v291_v48 = vsel %vm178_vm4, %v290_v44, -inf }
 0x27a   :  { %292 = vmax.xlane.f32.xlu0 %v291_v48 }
 0x27e   :  { %v407_v49 = vpop.f32.mrb[8].mxu1 }
 0x27f   :  { %v413_v50 = vmul.f32 0.5, %v407_v49  ;;  %v2422_v51 = vpop.f32.mrb[9].mxu1 }
 0x280   :  { %v410_v52 = vpop.f32.mrb[10].mxu1 }
 0x281   :  { %v2423_v53 = vpop.f32.mrb[11].mxu1  ;;  %v414_v54 = vsel %vm178_vm4, %v413_v50, -inf }
 0x282   :  { %415 = vmax.xlane.f32.xlu0 %v414_v54 }
 0x286   :  { %v518_v55 = vpop.f32.mrb[12].mxu1 }
 0x287   :  { %v524_v56 = vmul.f32 0.5, %v518_v55  ;;  %v2434_v57 = vpop.f32.mrb[13].mxu1 }
 0x288   :  { %v521_v58 = vpop.f32.mrb[14].mxu1 }
 0x289   :  { %v2435_v59 = vpop.f32.mrb[15].mxu1  ;;  %v525_v60 = vsel %vm178_vm4, %v524_v56, -inf }
 0x28a   :  { %526 = vmax.xlane.f32.xlu1 %v525_v60 }
 0x28e   :  { %v647_v61 = vpop.f32.mrb[16].mxu1 }
 0x28f   :  { %v653_v62 = vmul.f32 0.5, %v647_v61  ;;  %v2446_v63 = vpop.f32.mrb[17].mxu1 }
 0x290   :  { %v650_v1 = vpop.f32.mrb[18].mxu1 }
 0x291   :  { %v2447_v2 = vpop.f32.mrb[19].mxu1  ;;  %v654_v3 = vsel %vm178_vm4, %v653_v62, -inf }
 0x292   :  { %655 = vmax.xlane.f32.xlu0 %v654_v3 }
 0x296   :  { %v758_v4 = vpop.f32.mrb[20].mxu1 }
 0x297   :  { %v3032_v5 = vmul.f32 0.5, %v758_v4  ;;  %v2458_v6 = vpop.f32.mrb[21].mxu1 }
 0x298   :  { %v761_v7 = vpop.f32.mrb[22].mxu1 }
 0x299   :  { %v2459_v8 = vpop.f32.mrb[23].mxu1  ;;  %v765_v9 = vsel %vm178_vm4, %v3032_v5, -inf }
 0x29a   :  { %766 = vmax.xlane.f32.xlu1 %v765_v9 }
 0x29e   :  { %v887_v14 = vpop.f32.mrb[24].mxu1 }
 0x29f   :  { %v893_v15 = vmul.f32 0.5, %v887_v14  ;;  %v2470_v16 = vpop.f32.mrb[25].mxu1 }
 0x2a0   :  { %v890_v17 = vpop.f32.mrb[26].mxu1 }
 0x2a1   :  { %v2471_v18 = vpop.f32.mrb[27].mxu1  ;;  %v894_v19 = vsel %vm178_vm4, %v893_v15, -inf }
 0x2a2   :  { %895 = vmax.xlane.f32.xlu0 %v894_v19 }
 0x2a6   :  { %v998_v20 = vpop.f32.mrb[28].mxu1 }
 0x2a7   :  { %v2482_v21 = vpop.f32.mrb[29].mxu1  ;;  %v3041_v24 = vmul.f32 0.5, %v998_v20 }
 0x2a8   :  { %v1001_v22 = vpop.f32.mrb[30].mxu1 }
 0x2a9   :  { %v2483_v23 = vpop.f32.mrb[31].mxu1  ;;  %v1005_v25 = vsel %vm178_vm4, %v3041_v24, -inf }
 0x2ab   :  { %303 = vrot.lane.b32.xlu1 %v2949_v10, %s2849_s14 }
 0x2b8   :  { %191 = vrot.lane.b32.xlu0 %v2949_v10, %s2829_s27 }
 0x2cf   :  { %1006 = vmax.xlane.f32.xlu1 %v1005_v25 }
 0x2e0   :  { %426 = vrot.lane.b32.xlu1 %v2955_v11, %s2850_s15 }
 0x2ff   :  { %v181_v26 = vpop.xlane.xlu1 %180 }
 0x300   :  { %v182_v27 = vsub.f32 %v177_v38, %v181_v26 }
 0x302   :  { %v183_v28 = vmul.f32 1.442695, %v182_v27 }
 0x304   :  { %2669 = vpow2.f32 %v183_v28 }
 0x307   :  { %v293_v29 = vpop.xlane.xlu0 %292 }
 0x308   :  { %v294_v30 = vsub.f32 %v290_v44, %v293_v29 }
 0x30a   :  { %v295_v31 = vmul.f32 1.442695, %v294_v30 }
 0x30c   :  { %2671 = vpow2.f32 %v295_v31 }
 0x30e   :  { %v3047_v32 = vpop.eup %2669 }
 0x30f   :  { %v416_v10 = vpop.xlane.xlu0 %415  ;;  %v185_v33 = vsel %vm178_vm4, %v3047_v32, 0.0 }
 0x310   :  { %v417_v34 = vsub.f32 %v413_v50, %v416_v10  ;;  %186 = vadd.xlane.f32.xlu0 %v185_v33 }
 0x312   :  { %v418_v35 = vmul.f32 1.442695, %v417_v34 }
 0x314   :  { %2673 = vpow2.f32 %v418_v35 }
 0x316   :  { %v3051_v36 = vpop.eup %2671 }
 0x317   :  { %v527_v37 = vpop.xlane.xlu1 %526  ;;  %v297_v38 = vsel %vm178_vm4, %v3051_v36, 0.0 }
 0x318   :  { %v528_v39 = vsub.f32 %v524_v56, %v527_v37  ;;  %298 = vadd.xlane.f32.xlu1 %v297_v38 }
 0x31a   :  { %v529_v40 = vmul.f32 1.442695, %v528_v39 }
 0x31c   :  { %2675 = vpow2.f32 %v529_v40 }
 0x31e   :  { %v3055_v41 = vpop.eup %2673 }
 0x31f   :  { %v656_v42 = vpop.xlane.xlu0 %655  ;;  %v420_v43 = vsel %vm178_vm4, %v3055_v41, 0.0 }
 0x320   :  { %v657_v44 = vsub.f32 %v653_v62, %v656_v42  ;;  %421 = vadd.xlane.f32.xlu0 %v420_v43 }
 0x322   :  { %v658_v45 = vmul.f32 1.442695, %v657_v44 }
 0x324   :  { %2677 = vpow2.f32 %v658_v45 }
 0x326   :  { %v3059_v46 = vpop.eup %2675 }
 0x327   :  { %v531_v47 = vsel %vm178_vm4, %v3059_v46, 0.0  ;;  %v767_v55 = vpop.xlane.xlu1 %766 }
 0x328   :  { %532 = vadd.xlane.f32.xlu1 %v531_v47  ;;  %v768_v57 = vsub.f32 %v3032_v5, %v767_v55 }
 0x32a   :  { %v769_v59 = vmul.f32 1.442695, %v768_v57 }
 0x32e   :  { %v3063_v48 = vpop.eup %2677 }
 0x32f   :  { %v896_v49 = vpop.xlane.xlu0 %895  ;;  %v660_v50 = vsel %vm178_vm4, %v3063_v48, 0.0 }
 0x330   :  { %v897_v51 = vsub.f32 %v893_v15, %v896_v49  ;;  %661 = vadd.xlane.f32.xlu1 %v660_v50  ;;  %v2659_v49 = vld [vmem:[#allocation7] sm:$0xff]  }
 0x332   :  { %v898_v52 = vmul.f32 1.442695, %v897_v51  ;;  %v2660_v51 = vld [vmem:[#allocation7 + $0x8] sm:$0xff]  }
 0x333   :  { %v192_v53 = vpop.permute.xlu0 %191 }
 0x334   :  { %2679 = vpow2.f32 %v898_v52  ;;  %v198_v54 = vsel %vm196_vm5, %v192_v53, 0  ;;  %v1149_v52 = vld [vmem:[#allocation4 + $0x4] sm:$0xf] }
 0x335   :  { %2401 = vmatpush3.bf16.msra.mxu0 %v198_v54  ;;  %2681 = vpow2.f32 %v769_v59 }
 0x336   :  { %537 = vrot.lane.b32.xlu0 %v2955_v11, %s2851_s16  ;;  %2412 = vmatprep.subr.bf16.mxu0 %v2832_v0  ;;  %v304_v11 = vpop.permute.xlu1 %303 }
 0x337   :  { %v309_v14 = vsel %vm196_vm5, %v304_v11, 0 }
 0x33e   :  { %v3071_v56 = vpop.eup %2679 }
 0x33f   :  { %v900_v58 = vsel %vm178_vm4, %v3071_v56, 0.0  ;;  %v3076_v60 = vpop.eup %2681 }
 0x340   :  { %901 = vadd.xlane.f32.xlu1 %v900_v58  ;;  %v771_v61 = vsel %vm178_vm4, %v3076_v60, 0.0 }
 0x355   :  { %772 = vadd.xlane.f32.xlu0 %v771_v61 }
 0x35c   :  { %v1007_v62 = vpop.xlane.xlu1 %1006 }
 0x35d   :  { %v1008_v63 = vsub.f32 %v3041_v24, %v1007_v62 }
 0x35f   :  { %v1009_v1 = vmul.f32 1.442695, %v1008_v63 }
 0x360   :  { %v427_v5 = vpop.permute.xlu1 %426 }
 0x361   :  { %2683 = vpow2.f32 %v1009_v1  ;;  %v432_v17 = vsel %vm196_vm5, %v427_v5, 0 }
 0x36b   :  { %v3081_v2 = vpop.eup %2683  ;;  %777 = vrot.lane.b32.xlu0 %v2965_v12, %s2852_s17 }
 0x36c   :  { %v1011_v3 = vsel %vm178_vm4, %v3081_v2, 0.0 }
 0x36d   :  { %1012 = vadd.xlane.f32.xlu1 %v1011_v3 }
 0x36f   :  { %906 = vrot.lane.b32.xlu0 %v2975_v13, %s2853_s19 }
 0x373   :  { %1017 = vrot.lane.b32.xlu0 %v2975_v13, %s2854_s20 }
 0x37e   :  { %666 = vrot.lane.b32.xlu1 %v2965_v12, %s2855_s21 }
 0x39d   :  { %v187_v4 = vpop.xlane.xlu0 %186 }
 0x39e   :  { %2685 = vrcp.f32 %v187_v4 }
 0x3a5   :  { %v299_v6 = vpop.xlane.xlu1 %298 }
 0x3a6   :  { %2687 = vrcp.f32 %v299_v6 }
 0x3a8   :  { %v2686_v7 = vpop.eup %2685 }
 0x3a9   :  { %v189_v8 = vmul.f32 %v2686_v7, %v3047_v32 }
 0x3ab   :  { %v190_v9 = vpack.c.bf16 %v189_v8, %v189_v8 }
 0x3ad   :  { %2403 = vmatmul.mubr.msk.bf16.vlgmr.msra.gmra.mrb[4].mxu0 %vm178_vm4, %v190_v9  ;;  %v422_v15 = vpop.xlane.xlu0 %421 }
 0x3ae   :  { %2413 = vmatpush3.bf16.msra.mxu0 %v309_v14  ;;  %2689 = vrcp.f32 %v422_v15  ;;  %2414 = vmatprep.mubr.msk.bf16.mxu0 %vm2833_vm0, %v2832_v0 }
 0x3af   :  { %2424 = vmatprep.subr.bf16.mxu0 %v2832_v0 }
 0x3b0   :  { %v2688_v12 = vpop.eup %2687 }
 0x3b1   :  { %v301_v13 = vmul.f32 %v2688_v12, %v3051_v36  ;;  %v538_v21 = vpop.permute.xlu0 %537 }
 0x3b2   :  { %v543_v23 = vsel %vm196_vm5, %v538_v21, 0 }
 0x3b3   :  { %v302_v16 = vpack.c.bf16 %v301_v13, %v301_v13 }
 0x3b5   :  { %v533_v18 = vpop.xlane.xlu1 %532  ;;  %2415 = vmatmul.mubr.msk.bf16.vlgmr.msra.gmra.mrb[8].mxu0 %vm178_vm4, %v302_v16 }
 0x3b6   :  { %2691 = vrcp.f32 %v533_v18  ;;  %2425 = vmatpush3.bf16.msra.mxu0 %v432_v17  ;;  %2426 = vmatprep.mubr.msk.bf16.mxu0 %vm2833_vm0, %v2832_v0 }
 0x3b7   :  { %2436 = vmatprep.subr.bf16.mxu0 %v2832_v0 }
 0x3b8   :  { %v2690_v19 = vpop.eup %2689 }
 0x3b9   :  { %v424_v20 = vmul.f32 %v2690_v19, %v3055_v41 }
 0x3bb   :  { %v425_v22 = vpack.c.bf16 %v424_v20, %v424_v20 }
 0x3bd   :  { %2427 = vmatmul.mubr.msk.bf16.vlgmr.msra.gmra.mrb[12].mxu0 %vm178_vm4, %v425_v22  ;;  %v662_v27 = vpop.xlane.xlu1 %661 }
 0x3be   :  { %2437 = vmatpush3.bf16.msra.mxu0 %v543_v23  ;;  %2438 = vmatprep.mubr.msk.bf16.mxu0 %vm2833_vm0, %v2832_v0  ;;  %2693 = vrcp.f32 %v662_v27 }
 0x3bf   :  { %2448 = vmatprep.subr.bf16.mxu0 %v2832_v0 }
 0x3c0   :  { %v2692_v24 = vpop.eup %2691 }
 0x3c1   :  { %v535_v25 = vmul.f32 %v2692_v24, %v3059_v46 }
 0x3c3   :  { %v536_v26 = vpack.c.bf16 %v535_v25, %v535_v25 }
 0x3c5   :  { %2439 = vmatmul.mubr.msk.bf16.vlgmr.msra.gmra.mrb[16].mxu0 %vm178_vm4, %v536_v26 }
 0x3c6   :  { %2450 = vmatprep.mubr.msk.bf16.mxu0 %vm2833_vm0, %v2832_v0 }
 0x3c8   :  { %v2694_v30 = vpop.eup %2693 }
 0x3c9   :  { %v664_v32 = vmul.f32 %v2694_v30, %v3063_v48 }
 0x3cb   :  { %v665_v35 = vpack.c.bf16 %v664_v32, %v664_v32 }
 0x3cd   :  { %v902_v29 = vpop.xlane.xlu1 %901 }
 0x3e2   :  { %v773_v28 = vpop.xlane.xlu0 %772 }
 0x3e3   :  { %2695 = vrcp.f32 %v773_v28 }
 0x3e4   :  { %2697 = vrcp.f32 %v902_v29  ;;  %v2665_v29 = vld [vmem:[#allocation9] sm:$0xff]  }
 0x3e5   :  { %2491 = vmatpush3.bf16.msra.mxu1 %v2665_v29 }
 0x3e6   :  { %v778_v34 = vpop.permute.xlu0 %777  ;;  %2492 = vmatprep.subr.bf16.mxu1 %v2832_v0 }
 0x3e7   :  { %v783_v37 = vsel %vm196_vm5, %v778_v34, 0 }
 0x3ea   :  { %v907_v39 = vpop.permute.xlu0 %906 }
 0x3eb   :  { %v912_v42 = vsel %vm196_vm5, %v907_v39, 0 }
 0x3ed   :  { %v2696_v36 = vpop.eup %2695 }
 0x3ee   :  { %v775_v38 = vmul.f32 %v2696_v36, %v3076_v60  ;;  %v2698_v41 = vpop.eup %2697  ;;  %v1018_v44 = vpop.permute.xlu0 %1017 }
 0x3ef   :  { %v904_v43 = vmul.f32 %v2698_v41, %v3071_v56  ;;  %v1023_v47 = vsel %vm196_vm5, %v1018_v44, 0 }
 0x3f0   :  { %v776_v40 = vpack.c.bf16 %v775_v38, %v775_v38 }
 0x3f1   :  { %v905_v45 = vpack.c.bf16 %v904_v43, %v904_v43 }
 0x3fa   :  { %v1013_v31 = vpop.xlane.xlu1 %1012 }
 0x3fb   :  { %2699 = vrcp.f32 %v1013_v31  ;;  %v2666_v31 = vld [vmem:[#allocation9 + $0x8] sm:$0xff]  }
 0x3fc   :  { %2493 = vmatpush3.bf16.msra.mxu1 %v2666_v31 }
 0x3fd   :  { %2506 = vmatprep.subr.bf16.mxu1 %v2832_v0 }
 0x3fe   :  { %v667_v10 = vpop.permute.xlu1 %666 }
 0x3ff   :  { %v672_v33 = vsel %vm196_vm5, %v667_v10, 0 }
 0x400   :  { %2449 = vmatpush3.bf16.msra.mxu0 %v672_v33 }
 0x401   :  { %2460 = vmatprep.subr.bf16.mxu0 %v2832_v0 }
 0x403   :  { %2451 = vmatmul.mubr.msk.bf16.vlgmr.msra.gmra.mrb[20].mxu0 %vm178_vm4, %v665_v35 }
 0x404   :  { %2461 = vmatpush3.bf16.msra.mxu0 %v783_v37  ;;  %2462 = vmatprep.mubr.msk.bf16.mxu0 %vm2833_vm0, %v2832_v0 }
 0x405   :  { %2472 = vmatprep.subr.bf16.mxu0 %v2832_v0  ;;  %v2700_v46 = vpop.eup %2699 }
 0x406   :  { %v1015_v48 = vmul.f32 %v2700_v46, %v3081_v2 }
 0x408   :  { %v1016_v50 = vpack.c.bf16 %v1015_v48, %v1015_v48 }
 0x40b   :  { %2463 = vmatmul.mubr.msk.bf16.vlgmr.msra.gmra.mrb[24].mxu0 %vm178_vm4, %v776_v40 }
 0x40c   :  { %2473 = vmatpush3.bf16.msra.mxu0 %v912_v42  ;;  %2474 = vmatprep.mubr.msk.bf16.mxu0 %vm2833_vm0, %v2832_v0 }
 0x40d   :  { %2484 = vmatprep.subr.bf16.mxu0 %v2832_v0 }
 0x413   :  { %2475 = vmatmul.mubr.msk.bf16.vlgmr.msra.gmra.mrb[28].mxu0 %vm178_vm4, %v905_v45 }
 0x414   :  { %2485 = vmatpush3.bf16.msra.mxu0 %v1023_v47  ;;  %2486 = vmatprep.mubr.msk.bf16.mxu0 %vm2833_vm0, %v2832_v0 }
 0x415   :  { %2498 = vmatprep.subr.bf16.mxu0 %v2832_v0 }
 0x41b   :  { %2487 = vmatmul.mubr.msk.bf16.vlgmr.msra.gmra.mrb[32].mxu0 %vm178_vm4, %v1016_v50 }
 0x41c   :  { %2499 = vmatpush3.bf16.msra.mxu0 %v2659_v49  ;;  %2502 = vmatprep.mubr.msk.bf16.mxu0 %vm2833_vm0, %v2832_v0 }
 0x41d   :  { %2500 = vmatprep.subr.bf16.mxu0 %v2832_v0 }
 0x420   :  { %2501 = vmatpush3.bf16.msra.mxu0 %v2660_v51 }
 0x421   :  { %2512 = vmatprep.subr.bf16.mxu0 %v2832_v0 }
 0x423   :  { %2503 = vmatmul.mubr.msk.bf16.vlgmr.msra.gmra.mrb[36].mxu0 %vm77_vm1, %v1149_v52 }
 0x424   :  { %2514 = vmatprep.mubr.msk.bf16.mxu0 %vm2833_vm0, %v2832_v0 }
 0x480   :  { %v234_v53 = vpop.f32.mrb[4].mxu0 }
 0x481   :  { %v2404_v54 = vpop.f32.mrb[5].mxu0 }
 0x482   :  { %v237_v55 = vpop.f32.mrb[6].mxu0 }
 0x483   :  { %v2405_v56 = vpop.f32.mrb[7].mxu0 }
 0x488   :  { %v345_v57 = vpop.f32.mrb[8].mxu0 }
 0x489   :  { %v2416_v58 = vpop.f32.mrb[9].mxu0 }
 0x48a   :  { %v348_v59 = vpop.f32.mrb[10].mxu0 }
 0x48b   :  { %v2417_v60 = vpop.f32.mrb[11].mxu0 }
 0x490   :  { %v468_v61 = vpop.f32.mrb[12].mxu0 }
 0x491   :  { %v2428_v11 = vpop.f32.mrb[13].mxu0 }
 0x492   :  { %v471_v62 = vpop.f32.mrb[14].mxu0 }
 0x493   :  { %v2429_v63 = vpop.f32.mrb[15].mxu0 }
 0x498   :  { %v579_v1 = vpop.f32.mrb[16].mxu0 }
 0x499   :  { %v2440_v2 = vpop.f32.mrb[17].mxu0 }
 0x49a   :  { %v582_v3 = vpop.f32.mrb[18].mxu0 }
 0x49b   :  { %v2441_v4 = vpop.f32.mrb[19].mxu0 }
 0x4d6   :  { %v708_v5 = vpop.f32.mrb[20].mxu0 }
 0x4d7   :  { %v2452_v6 = vpop.f32.mrb[21].mxu0 }
 0x4d8   :  { %v711_v7 = vpop.f32.mrb[22].mxu0 }
 0x4d9   :  { %v2453_v8 = vpop.f32.mrb[23].mxu0 }
 0x4de   :  { %v819_v9 = vpop.f32.mrb[24].mxu0 }
 0x4df   :  { %v2643_v14 = vpack.i.bf16 %v819_v9, %v579_v1  ;;  %v2464_v15 = vpop.f32.mrb[25].mxu0 }
 0x4e0   :  { %v822_v12 = vpop.f32.mrb[26].mxu0  ;;  %v1086_v15 = vlaneseq }
 0x4e1   :  { %2644 = vrot.lane.b32.xlu1 %v2643_v14, %s2830_s28  ;;  %v2465_v13 = vpop.f32.mrb[27].mxu0 }
 0x4e2   :  { %v3242_v12 = vshrl.u32 %v1086_v15, 7  ;;  %v1084_v13 = vld [vmem:[%s3396_s3] sm:$0x1] }
 0x4e5   :  { %352 = vrot.lane.b32.xlu1 %v345_v57, %s2830_s28 }
 0x4e6   :  { %v948_v16 = vpop.f32.mrb[28].mxu0 }
 0x4e7   :  { %v2476_v17 = vpop.f32.mrb[29].mxu0 }
 0x4e8   :  { %v951_v18 = vpop.f32.mrb[30].mxu0  ;;  %v1088_v17 = vsub.s32 0, %v3242_v12 }
 0x4e9   :  { %v2477_v19 = vpop.f32.mrb[31].mxu0 }
 0x4ee   :  { %v1059_v20 = vpop.f32.mrb[32].mxu0 }
 0x4ef   :  { %1066 = vrot.lane.b32.xlu0 %v1059_v20, %s2830_s28  ;;  %v2488_v21 = vpop.f32.mrb[33].mxu0 }
 0x4f0   :  { %v1062_v22 = vpop.f32.mrb[34].mxu0 }
 0x4f1   :  { %v2489_v23 = vpop.f32.mrb[35].mxu0 }
 0x4f6   :  { %v1203_v24 = vpop.f32.mrb[36].mxu0 }
 0x4f7   :  { %v1209_v25 = vpack.c.bf16 %v1203_v24, %v1203_v24  ;;  %v2504_v26 = vpop.f32.mrb[37].mxu0 }
 0x4f8   :  { %v1206_v27 = vpop.f32.mrb[38].mxu0 }
 0x4f9   :  { %1210 = vst.msk [vmem:[#allocation2] sm:$0xf] %vm122_vm2, %v1209_v25  ;;  %v2505_v28 = vpop.f32.mrb[39].mxu0 }
 0x500   :  { %v1211_v35 = vld [vmem:[#allocation2] sm:$0xf] }
 0x501   :  { %v3155_v41 = vcombine.low %v1211_v35, %v1211_v35  ;;  %v3162_v43 = vld [vmem:[#allocation2] ss:$0 sps:$4 sm:$0xff]  }
 0x502   :  { %v3172_v46 = vld [vmem:[#allocation2] ss:$0 sps:$4 sm:$0xff]  }
 0x503   :  { %v3182_v47 = vld [vmem:[#allocation2] ss:$0 sps:$4 sm:$0xff]  }
 0x553   :  { %v2645_v30 = vpop.permute.xlu1 %2644 }
 0x554   :  { %v2647_v32 = vunpack.i.h.bf16 %v2645_v30  ;;  %v2646_v10 = vunpack.i.l.bf16 %v2645_v30 }
 0x556   :  { %v829_v33 = vsel %vm130_vm3, %v708_v5, %v2647_v32  ;;  %v589_v34 = vsel %vm130_vm3, %v468_v61, %v2646_v10 }
 0x557   :  { %v353_v36 = vpop.permute.xlu1 %352  ;;  %v2305_v37 = vpack.c.bf16 %v829_v33, %v829_v33  ;;  %v2304_v38 = vpack.c.bf16 %v589_v34, %v589_v34 }
 0x558   :  { %v355_v39 = vsel %vm130_vm3, %v234_v53, %v353_v36 }
 0x559   :  { %v356_v40 = vpack.c.bf16 %v355_v39, %v355_v39  ;;  %834 = vrot.lane.b32.xlu1 %v2305_v37, %s2856_s22  ;;  %594 = vrot.lane.b32.xlu0 %v2304_v38, %s2857_s23 }
 0x55b   :  { %358 = vst.msk [vmem:[#allocation3] sm:$0xf] %vm357_vm6, %v356_v40 }
 0x55d   :  { %1215 = vrot.lane.b32.xlu1 %v3155_v41, %s2835_s25 }
 0x561   :  { %v1067_v42 = vpop.permute.xlu0 %1066  ;;  %1324 = vrot.lane.b32.xlu1 %v3155_v41, %s2834_s2 }
 0x562   :  { %v1069_v44 = vsel %vm130_vm3, %v948_v16, %v1067_v42  ;;  %v1085_v16 = vunpack.c.l.bf16 %v1084_v13 }
 0x563   :  { %v2306_v45 = vpack.c.bf16 %v1069_v44, %v1069_v44 }
 0x564   :  { %v1089_v18 = vrot.slane %v1085_v16, %v1088_v17 }
 0x565   :  { %1074 = vrot.lane.b32.xlu0 %v2306_v45, %s2858_s24  ;;  %1446 = vrot.lane.b32.xlu1 %v3162_v43, %s2839_s5 }
 0x569   :  { %1326 = vrot.lane.b32.xlu0 %v3155_v41, %s2837_s29  ;;  %1557 = vrot.lane.b32.xlu1 %v3162_v43, %s2841_s7 }
 0x56d   :  { %1448 = vrot.lane.b32.xlu0 %v3162_v43, %s2836_s26  ;;  %1685 = vrot.lane.b32.xlu1 %v3172_v46, %s2843_s9  ;;  %s2859_s26 = smov [#allocation10]  }
 0x56e   :  { %s2233_s29 = sshll.u32 %s2859_s26, 4  ;;  %s2234_s29 = int_to_ptr.vmem [resolvable:$true] %s2233_s29 }
 0x56f   :  { %p2804_p11 = scmp.lt.s32.totalorder %s2234_s29, %s2234_s29 }
 0x571   :  { %1559 = vrot.lane.b32.xlu0 %v3162_v43, %s2838_s30  ;;  %1796 = vrot.lane.b32.xlu1 %v3172_v46, %s2845_s11  ;;  %s2799_s30 = scalar_lea.vmem %s2234_s29, 128 }
 0x572   :  { %p2800_p10 = scmp.ne.s32.totalorder %s2234_s29, %s2799_s30  ;;  %p2805_p12 = scmp.lt.s32.totalorder %s2799_s30, %s2799_s30 }
 0x574   :  { %p2806_p13 = por %p2805_p12, %p2804_p11 }
 0x575   :  { %1687 = vrot.lane.b32.xlu0 %v3172_v46, %s2840_s6  ;;  %1924 = vrot.lane.b32.xlu1 %v3182_v47, %s2847_s1 }
 0x576   :  { %p2807_p0 = pnand %p2806_p13, %p2800_p10 }
 0x579   :  { %1798 = vrot.lane.b32.xlu0 %v3172_v46, %s2842_s8  ;;  %2035 = vrot.lane.b32.xlu1 %v3182_v47, %s2848_s13 }
 0x57d   :  { %1926 = vrot.lane.b32.xlu0 %v3182_v47, %s2844_s10 }
 0x581   :  { %2037 = vrot.lane.b32.xlu0 %v3182_v47, %s2846_s12 }
 0x5cb   :  { %v835_v48 = vpop.permute.xlu1 %834  ;;  %v595_v49 = vpop.permute.xlu0 %594 }
 0x5cc   :  { %598 = vst.msk [vmem:[#allocation3] sm:$0xf] %vm597_vm7, %v595_v49 }
 0x5cd   :  { %838 = vst.msk [vmem:[#allocation3] sm:$0xf] %vm837_vm8, %v835_v48 }
 0x5cf   :  { %v1216_v51 = vpop.permute.xlu1 %1215 }
 0x5d0   :  { %v1221_v52 = vsel %vm130_vm3, %v1216_v51, 0 }
 0x5d3   :  { %v1325_v57 = vpop.permute.xlu1 %1324 }
 0x5d7   :  { %v1075_v50 = vpop.permute.xlu0 %1074  ;;  %v1447_v60 = vpop.permute.xlu1 %1446 }
 0x5d8   :  { %1078 = vst.msk [vmem:[#allocation3] sm:$0xf] %vm1077_vm9, %v1075_v50 }
 0x5db   :  { %v1327_v54 = vpop.permute.xlu0 %1326  ;;  %v1558_v62 = vpop.permute.xlu1 %1557 }
 0x5dc   :  { %v1332_v55 = vsel %vm130_vm3, %v1327_v54, 0 }
 0x5df   :  { %v1079_v53 = vld [vmem:[#allocation3] sm:$0xf]  ;;  %v1449_v56 = vpop.permute.xlu0 %1448  ;;  %v1686_v2 = vpop.permute.xlu1 %1685 }
 0x5e0   :  { %2495 = vmatmul.mubr.msk.bf16.vlgmr.msra.gmra.mrb[32].mxu1 %vm77_vm1, %v1079_v53  ;;  %v1454_v58 = vsel %vm130_vm3, %v1449_v56, 0 }
 0x5e1   :  { %2507 = vmatpush3.bf16.xpose.msra.mxu1 %v1221_v52  ;;  %2508 = vmatprep.mubr.msk.bf16.mxu1 %vm2833_vm0, %v2832_v0 }
 0x5e2   :  { %2518 = vmatprep.subr.bf16.mxu1 %v2832_v0 }
 0x5e3   :  { %v1560_v59 = vpop.permute.xlu0 %1559  ;;  %v1797_v5 = vpop.permute.xlu1 %1796 }
 0x5e4   :  { %v1565_v61 = vsel %vm130_vm3, %v1560_v59, 0 }
 0x5e7   :  { %v1688_v11 = vpop.permute.xlu0 %1687  ;;  %v1925_v8 = vpop.permute.xlu1 %1924 }
 0x5e8   :  { %2509 = vmatmul.mubr.msk.bf16.vlgmr.msra.gmra.mrb[36].mxu1 %vm130_vm3, %v1211_v35  ;;  %v1693_v63 = vsel %vm130_vm3, %v1688_v11, 0 }
 0x5e9   :  { %2519 = vmatpush3.bf16.xpose.msra.mxu1 %v1332_v55  ;;  %2520 = vmatprep.mubr.msk.bf16.mxu1 %vm2833_vm0, %v2832_v0 }
 0x5ea   :  { %2530 = vmatprep.subr.bf16.mxu1 %v2832_v0 }
 0x5eb   :  { %v1799_v1 = vpop.permute.xlu0 %1798  ;;  %v2036_v14 = vpop.permute.xlu1 %2035 }
 0x5ec   :  { %v1804_v3 = vsel %vm130_vm3, %v1799_v1, 0 }
 0x5ef   :  { %v1927_v4 = vpop.permute.xlu0 %1926 }
 0x5f0   :  { %2521 = vmatmul.mubr.msk.bf16.vlgmr.msra.gmra.mrb[40].mxu1 %vm130_vm3, %v1325_v57  ;;  %v1932_v6 = vsel %vm130_vm3, %v1927_v4, 0 }
 0x5f1   :  { %2531 = vmatpush3.bf16.xpose.msra.mxu1 %v1454_v58  ;;  %2532 = vmatprep.mubr.msk.bf16.mxu1 %vm2833_vm0, %v2832_v0 }
 0x5f2   :  { %2542 = vmatprep.subr.bf16.mxu1 %v2832_v0 }
 0x5f3   :  { %v2038_v7 = vpop.permute.xlu0 %2037 }
 0x5f4   :  { %v2043_v9 = vsel %vm130_vm3, %v2038_v7, 0 }
 0x5f8   :  { %2533 = vmatmul.mubr.msk.bf16.vlgmr.msra.gmra.mrb[44].mxu1 %vm130_vm3, %v1447_v60 }
 0x5f9   :  { %2543 = vmatpush3.bf16.xpose.msra.mxu1 %v1565_v61  ;;  %2544 = vmatprep.mubr.msk.bf16.mxu1 %vm2833_vm0, %v2832_v0 }
 0x5fa   :  { %2554 = vmatprep.subr.bf16.mxu1 %v2832_v0 }
 0x600   :  { %2545 = vmatmul.mubr.msk.bf16.vlgmr.msra.gmra.mrb[48].mxu1 %vm130_vm3, %v1558_v62 }
 0x601   :  { %2555 = vmatpush3.bf16.xpose.msra.mxu1 %v1693_v63  ;;  %2556 = vmatprep.mubr.msk.bf16.mxu1 %vm2833_vm0, %v2832_v0 }
 0x602   :  { %2566 = vmatprep.subr.bf16.mxu1 %v2832_v0 }
 0x608   :  { %2557 = vmatmul.mubr.msk.bf16.vlgmr.msra.gmra.mrb[52].mxu1 %vm130_vm3, %v1686_v2 }
 0x609   :  { %2567 = vmatpush3.bf16.xpose.msra.mxu1 %v1804_v3  ;;  %2568 = vmatprep.mubr.msk.bf16.mxu1 %vm2833_vm0, %v2832_v0 }
 0x60a   :  { %2578 = vmatprep.subr.bf16.mxu1 %v2832_v0 }
 0x610   :  { %2569 = vmatmul.mubr.msk.bf16.vlgmr.msra.gmra.mrb[56].mxu1 %vm130_vm3, %v1797_v5 }
 0x611   :  { %2579 = vmatpush3.bf16.xpose.msra.mxu1 %v1932_v6  ;;  %2580 = vmatprep.mubr.msk.bf16.mxu1 %vm2833_vm0, %v2832_v0 }
 0x612   :  { %2590 = vmatprep.subr.bf16.mxu1 %v2832_v0 }
 0x618   :  { %2581 = vmatmul.mubr.msk.bf16.vlgmr.msra.gmra.mrb[60].mxu1 %vm130_vm3, %v1925_v8 }
 0x619   :  { %2591 = vmatpush3.bf16.xpose.msra.mxu1 %v2043_v9  ;;  %2592 = vmatprep.mubr.msk.bf16.mxu1 %vm2833_vm0, %v2832_v0 }
 0x61a   :  { %2602 = vmatprep.subr.bf16.mxu1 %v2832_v0 }
 0x620   :  { %2593 = vmatmul.mubr.msk.bf16.vlgmr.msra.gmra.mrb[64].mxu1 %vm130_vm3, %v2036_v14 }
 0x621   :  { %2606 = vmatprep.mubr.msk.bf16.mxu1 %vm2833_vm0, %v2832_v0 }
 0x6b3   :  { %v1139_v19 = vpop.f32.mrb[32].mxu1 }
 0x6b4   :  { %v1140_v20 = vadd.f32 %v1139_v19, %v1089_v18  ;;  %v2496_v21 = vpop.f32.mrb[33].mxu1 }
 0x6b5   :  { %v1142_v22 = vpop.f32.mrb[34].mxu1 }
 0x6b6   :  { %v1145_v23 = vpack.c.bf16 %v1140_v20, %v1140_v20  ;;  %v2497_v24 = vpop.f32.mrb[35].mxu1 }
 0x6b8   :  { %1147 = vst.msk [vmem:[#allocation10] sm:$0xf] %vm1146_vm10, %v1145_v23 }
 0x6bb   :  { %v1257_v25 = vpop.f32.mrb[36].mxu1 }
 0x6bc   :  { %v1263_v26 = vmul.f32 0.5, %v1257_v25  ;;  %v2510_v27 = vpop.f32.mrb[37].mxu1 }
 0x6bd   :  { %v1260_v28 = vpop.f32.mrb[38].mxu1 }
 0x6be   :  { %v2511_v29 = vpop.f32.mrb[39].mxu1  ;;  %v1264_v30 = vsel %vm178_vm4, %v1263_v26, -inf }
 0x6bf   :  { %1265 = vmax.xlane.f32.xlu0 %v1264_v30 }
 0x6c3   :  { %v1368_v31 = vpop.f32.mrb[40].mxu1 }
 0x6c4   :  { %v1374_v32 = vmul.f32 0.5, %v1368_v31  ;;  %v2522_v10 = vpop.f32.mrb[41].mxu1 }
 0x6c5   :  { %v1371_v33 = vpop.f32.mrb[42].mxu1 }
 0x6c6   :  { %v2523_v34 = vpop.f32.mrb[43].mxu1  ;;  %v1375_v35 = vsel %vm178_vm4, %v1374_v32, -inf }
 0x6c7   :  { %1376 = vmax.xlane.f32.xlu1 %v1375_v35 }
 0x6cb   :  { %v1490_v36 = vpop.f32.mrb[44].mxu1 }
 0x6cc   :  { %v1496_v37 = vmul.f32 0.5, %v1490_v36  ;;  %v2534_v38 = vpop.f32.mrb[45].mxu1 }
 0x6cd   :  { %v1493_v39 = vpop.f32.mrb[46].mxu1 }
 0x6ce   :  { %v2535_v40 = vpop.f32.mrb[47].mxu1  ;;  %v1497_v42 = vsel %vm178_vm4, %v1496_v37, -inf }
 0x6cf   :  { %1498 = vmax.xlane.f32.xlu0 %v1497_v42 }
 0x6d3   :  { %v1601_v44 = vpop.f32.mrb[48].mxu1 }
 0x6d4   :  { %v3254_v45 = vmul.f32 0.5, %v1601_v44  ;;  %v2546_v48 = vpop.f32.mrb[49].mxu1 }
 0x6d5   :  { %v1604_v49 = vpop.f32.mrb[50].mxu1 }
 0x6d6   :  { %v2547_v50 = vpop.f32.mrb[51].mxu1  ;;  %v1608_v51 = vsel %vm178_vm4, %v3254_v45, -inf }
 0x6d7   :  { %1609 = vmax.xlane.f32.xlu0 %v1608_v51 }
 0x6db   :  { %v1729_v52 = vpop.f32.mrb[52].mxu1 }
 0x6dc   :  { %v3258_v53 = vmul.f32 0.5, %v1729_v52  ;;  %v2558_v54 = vpop.f32.mrb[53].mxu1 }
 0x6dd   :  { %v1732_v55 = vpop.f32.mrb[54].mxu1 }
 0x6de   :  { %v2559_v56 = vpop.f32.mrb[55].mxu1  ;;  %v1736_v57 = vsel %vm178_vm4, %v3258_v53, -inf }
 0x6df   :  { %1737 = vmax.xlane.f32.xlu1 %v1736_v57 }
 0x6e3   :  { %v1840_v58 = vpop.f32.mrb[56].mxu1 }
 0x6e4   :  { %v1846_v59 = vmul.f32 0.5, %v1840_v58  ;;  %v2570_v60 = vpop.f32.mrb[57].mxu1 }
 0x6e5   :  { %v1843_v61 = vpop.f32.mrb[58].mxu1 }
 0x6e6   :  { %v2571_v11 = vpop.f32.mrb[59].mxu1  ;;  %v1847_v62 = vsel %vm178_vm4, %v1846_v59, -inf }
 0x6e7   :  { %1848 = vmax.xlane.f32.xlu0 %v1847_v62 }
 0x6eb   :  { %v1968_v63 = vpop.f32.mrb[60].mxu1 }
 0x6ec   :  { %v1974_v1 = vmul.f32 0.5, %v1968_v63  ;;  %v2582_v2 = vpop.f32.mrb[61].mxu1 }
 0x6ed   :  { %v1971_v3 = vpop.f32.mrb[62].mxu1 }
 0x6ee   :  { %v2583_v4 = vpop.f32.mrb[63].mxu1  ;;  %v1975_v5 = vsel %vm178_vm4, %v1974_v1, -inf }
 0x6ef   :  { %1976 = vmax.xlane.f32.xlu1 %v1975_v5 }
 0x6f3   :  { %v2079_v6 = vpop.f32.mrb[64].mxu1 }
 0x6f4   :  { %v2594_v7 = vpop.f32.mrb[65].mxu1  ;;  %v2085_v14 = vmul.f32 0.5, %v2079_v6 }
 0x6f5   :  { %v2082_v8 = vpop.f32.mrb[66].mxu1 }
 0x6f6   :  { %v2595_v9 = vpop.f32.mrb[67].mxu1  ;;  %v2086_v15 = vsel %vm178_vm4, %v2085_v14, -inf }
 0x6fd   :  { %1387 = vrot.lane.b32.xlu0 %v3155_v41, %s2849_s14 }
 0x700   :  { %1276 = vrot.lane.b32.xlu1 %v3155_v41, %s2829_s27 }
 0x71c   :  { %2087 = vmax.xlane.f32.xlu0 %v2086_v15 }
 0x74c   :  { %v1266_v13 = vpop.xlane.xlu0 %1265 }
 0x74d   :  { %v1267_v16 = vsub.f32 %v1263_v26, %v1266_v13 }
 0x74f   :  { %v1268_v18 = vmul.f32 1.442695, %v1267_v16 }
 0x751   :  { %2701 = vpow2.f32 %v1268_v18 }
 0x754   :  { %v1377_v19 = vpop.xlane.xlu1 %1376 }
 0x755   :  { %v1378_v20 = vsub.f32 %v1374_v32, %v1377_v19 }
 0x757   :  { %v1379_v21 = vmul.f32 1.442695, %v1378_v20 }
 0x759   :  { %2703 = vpow2.f32 %v1379_v21 }
 0x75b   :  { %v3269_v22 = vpop.eup %2701 }
 0x75c   :  { %v1499_v23 = vpop.xlane.xlu0 %1498  ;;  %v1270_v24 = vsel %vm178_vm4, %v3269_v22, 0.0 }
 0x75d   :  { %v1500_v25 = vsub.f32 %v1496_v37, %v1499_v23  ;;  %1271 = vadd.xlane.f32.xlu1 %v1270_v24 }
 0x75f   :  { %v1501_v41 = vmul.f32 1.442695, %v1500_v25 }
 0x761   :  { %2705 = vpow2.f32 %v1501_v41 }
 0x763   :  { %v3273_v27 = vpop.eup %2703 }
 0x764   :  { %v1381_v26 = vsel %vm178_vm4, %v3273_v27, 0.0  ;;  %v1610_v10 = vpop.xlane.xlu0 %1609 }
 0x765   :  { %1382 = vadd.xlane.f32.xlu0 %v1381_v26  ;;  %v1611_v34 = vsub.f32 %v3254_v45, %v1610_v10 }
 0x767   :  { %v1612_v35 = vmul.f32 1.442695, %v1611_v34 }
 0x769   :  { %2707 = vpow2.f32 %v1612_v35 }
 0x76b   :  { %v3277_v28 = vpop.eup %2705 }
 0x76c   :  { %v1503_v29 = vsel %vm178_vm4, %v3277_v28, 0.0  ;;  %v1738_v30 = vpop.xlane.xlu1 %1737 }
 0x76d   :  { %1504 = vadd.xlane.f32.xlu1 %v1503_v29  ;;  %v1739_v36 = vsub.f32 %v3258_v53, %v1738_v30 }
 0x76f   :  { %v1740_v39 = vmul.f32 1.442695, %v1739_v36 }
 0x771   :  { %2709 = vpow2.f32 %v1740_v39 }
 0x773   :  { %v2708_v44 = vpop.eup %2707 }
 0x774   :  { %v1849_v37 = vpop.xlane.xlu0 %1848  ;;  %v1614_v48 = vsel %vm178_vm4, %v2708_v44, 0.0 }
 0x775   :  { %v1850_v38 = vsub.f32 %v1846_v59, %v1849_v37 }
 0x777   :  { %v1851_v42 = vmul.f32 1.442695, %v1850_v38 }
 0x778   :  { %v1388_v54 = vpop.permute.xlu0 %1387 }
 0x779   :  { %2711 = vpow2.f32 %v1851_v42 }
 0x77b   :  { %1509 = vrot.lane.b32.xlu0 %v3162_v43, %s2850_s15  ;;  %v3290_v49 = vpop.eup %2709 }
 0x77c   :  { %v1977_v31 = vpop.xlane.xlu1 %1976  ;;  %v1742_v50 = vsel %vm178_vm4, %v3290_v49, 0.0 }
 0x77d   :  { %v1978_v40 = vsub.f32 %v1974_v1, %v1977_v31  ;;  %v1393_v1 = vsel %vm196_vm5, %v1388_v54, 0 }
 0x77e   :  { %1620 = vrot.lane.b32.xlu1 %v3162_v43, %s2851_s16 }
 0x77f   :  { %v1979_v43 = vmul.f32 1.442695, %v1978_v40 }
 0x780   :  { %v1277_v32 = vpop.permute.xlu1 %1276 }
 0x781   :  { %v1282_v33 = vsel %vm196_vm5, %v1277_v32, 0  ;;  %2713 = vpow2.f32 %v1979_v43 }
 0x782   :  { %2513 = vmatpush3.bf16.msra.mxu0 %v1282_v33 }
 0x783   :  { %2524 = vmatprep.subr.bf16.mxu0 %v2832_v0  ;;  %v3292_v45 = vpop.eup %2711 }
 0x784   :  { %v1853_v52 = vsel %vm178_vm4, %v3292_v45, 0.0 }
 0x78b   :  { %v3296_v51 = vpop.eup %2713 }
 0x78c   :  { %v1981_v53 = vsel %vm178_vm4, %v3296_v51, 0.0 }
 0x79a   :  { %1615 = vadd.xlane.f32.xlu0 %v1614_v48 }
 0x79e   :  { %1743 = vadd.xlane.f32.xlu0 %v1742_v50 }
 0x7a2   :  { %1854 = vadd.xlane.f32.xlu1 %v1853_v52  ;;  %1982 = vadd.xlane.f32.xlu0 %v1981_v53 }
 0x7a9   :  { %v2088_v55 = vpop.xlane.xlu0 %2087 }
 0x7aa   :  { %v2089_v56 = vsub.f32 %v2085_v14, %v2088_v55 }
 0x7ac   :  { %v2090_v57 = vmul.f32 1.442695, %v2089_v56 }
 0x7ae   :  { %2715 = vpow2.f32 %v2090_v57 }
 0x7b3   :  { %1859 = vrot.lane.b32.xlu1 %v3172_v46, %s2852_s17 }
 0x7b7   :  { %1987 = vrot.lane.b32.xlu1 %v3182_v47, %s2853_s19 }
 0x7b8   :  { %v3306_v58 = vpop.eup %2715 }
 0x7b9   :  { %v2092_v59 = vsel %vm178_vm4, %v3306_v58, 0.0 }
 0x7ba   :  { %2093 = vadd.xlane.f32.xlu0 %v2092_v59 }
 0x7bb   :  { %2098 = vrot.lane.b32.xlu1 %v3182_v47, %s2854_s20 }
 0x7d0   :  { %1748 = vrot.lane.b32.xlu0 %v3172_v46, %s2855_s21 }
 0x7ea   :  { %v1272_v60 = vpop.xlane.xlu1 %1271 }
 0x7eb   :  { %2717 = vrcp.f32 %v1272_v60 }
 0x7f2   :  { %v1383_v61 = vpop.xlane.xlu0 %1382 }
 0x7f3   :  { %2719 = vrcp.f32 %v1383_v61 }
 0x7f5   :  { %v2718_v11 = vpop.eup %2717 }
 0x7f6   :  { %v1274_v62 = vmul.f32 %v2718_v11, %v3269_v22  ;;  %v1510_v3 = vpop.permute.xlu0 %1509 }
 0x7f7   :  { %v1515_v5 = vsel %vm196_vm5, %v1510_v3, 0 }
 0x7f8   :  { %v1275_v63 = vpack.c.bf16 %v1274_v62, %v1274_v62 }
 0x7fa   :  { %2515 = vmatmul.mubr.msk.bf16.vlgmr.msra.gmra.mrb[40].mxu0 %vm178_vm4, %v1275_v63  ;;  %v1505_v2 = vpop.xlane.xlu1 %1504 }
 0x7fb   :  { %2525 = vmatpush3.bf16.msra.mxu0 %v1393_v1  ;;  %2721 = vrcp.f32 %v1505_v2  ;;  %2526 = vmatprep.mubr.msk.bf16.mxu0 %vm2833_vm0, %v2832_v0 }
 0x7fc   :  { %2536 = vmatprep.subr.bf16.mxu0 %v2832_v0 }
 0x7fd   :  { %v2720_v46 = vpop.eup %2719 }
 0x7fe   :  { %v1385_v47 = vmul.f32 %v2720_v46, %v3273_v27  ;;  %v1621_v8 = vpop.permute.xlu1 %1620 }
 0x7ff   :  { %v1626_v14 = vsel %vm196_vm5, %v1621_v8, 0 }
 0x800   :  { %v1386_v4 = vpack.c.bf16 %v1385_v47, %v1385_v47 }
 0x802   :  { %2527 = vmatmul.mubr.msk.bf16.vlgmr.msra.gmra.mrb[44].mxu0 %vm178_vm4, %v1386_v4 }
 0x803   :  { %2537 = vmatpush3.bf16.msra.mxu0 %v1515_v5  ;;  %2538 = vmatprep.mubr.msk.bf16.mxu0 %vm2833_vm0, %v2832_v0 }
 0x804   :  { %2548 = vmatprep.subr.bf16.mxu0 %v2832_v0 }
 0x805   :  { %v2722_v6 = vpop.eup %2721 }
 0x806   :  { %v1507_v7 = vmul.f32 %v2722_v6, %v3277_v28 }
 0x808   :  { %v1508_v9 = vpack.c.bf16 %v1507_v7, %v1507_v7 }
 0x80a   :  { %2539 = vmatmul.mubr.msk.bf16.vlgmr.msra.gmra.mrb[48].mxu0 %vm178_vm4, %v1508_v9 }
 0x80b   :  { %2549 = vmatpush3.bf16.msra.mxu0 %v1626_v14  ;;  %2550 = vmatprep.mubr.msk.bf16.mxu0 %vm2833_vm0, %v2832_v0 }
 0x80c   :  { %2560 = vmatprep.subr.bf16.mxu0 %v2832_v0 }
 0x827   :  { %v1616_v15 = vpop.xlane.xlu0 %1615 }
 0x828   :  { %2723 = vrcp.f32 %v1616_v15 }
 0x82b   :  { %v1744_v19 = vpop.xlane.xlu0 %1743 }
 0x82c   :  { %2725 = vrcp.f32 %v1744_v19 }
 0x82f   :  { %v1855_v20 = vpop.xlane.xlu1 %1854  ;;  %v1983_v21 = vpop.xlane.xlu0 %1982 }
 0x830   :  { %2727 = vrcp.f32 %v1855_v20 }
 0x831   :  { %2729 = vrcp.f32 %v1983_v21 }
 0x832   :  { %v2724_v13 = vpop.eup %2723 }
 0x833   :  { %v1618_v16 = vmul.f32 %v2724_v13, %v2708_v44  ;;  %v1860_v27 = vpop.permute.xlu1 %1859 }
 0x834   :  { %v1865_v29 = vsel %vm196_vm5, %v1860_v27, 0 }
 0x835   :  { %v1619_v18 = vpack.c.bf16 %v1618_v16, %v1618_v16 }
 0x836   :  { %v2726_v22 = vpop.eup %2725 }
 0x837   :  { %2551 = vmatmul.mubr.msk.bf16.vlgmr.msra.gmra.mrb[52].mxu0 %vm178_vm4, %v1619_v18  ;;  %v1746_v24 = vmul.f32 %v2726_v22, %v3290_v49  ;;  %v1988_v31 = vpop.permute.xlu1 %1987 }
 0x838   :  { %2562 = vmatprep.mubr.msk.bf16.mxu0 %vm2833_vm0, %v2832_v0  ;;  %v1993_v33 = vsel %vm196_vm5, %v1988_v31, 0 }
 0x839   :  { %v1747_v26 = vpack.c.bf16 %v1746_v24, %v1746_v24 }
 0x83a   :  { %v2728_v28 = vpop.eup %2727 }
 0x83b   :  { %v1857_v30 = vmul.f32 %v2728_v28, %v3292_v45  ;;  %v2730_v10 = vpop.eup %2729  ;;  %v2099_v35 = vpop.permute.xlu1 %2098 }
 0x83c   :  { %v1985_v34 = vmul.f32 %v2730_v10, %v3296_v51  ;;  %v2104_v38 = vsel %vm196_vm5, %v2099_v35, 0 }
 0x83d   :  { %v1858_v32 = vpack.c.bf16 %v1857_v30, %v1857_v30 }
 0x83e   :  { %v1986_v36 = vpack.c.bf16 %v1985_v34, %v1985_v34 }
 0x847   :  { %v2094_v23 = vpop.xlane.xlu0 %2093 }
 0x848   :  { %2731 = vrcp.f32 %v2094_v23 }
 0x84b   :  { %v1749_v25 = vpop.permute.xlu0 %1748 }
 0x84c   :  { %v1754_v41 = vsel %vm196_vm5, %v1749_v25, 0  ;;  %v2667_v25 = vld [vmem:[#allocation9] sm:$0xff]  }
 0x84d   :  { %2561 = vmatpush3.bf16.msra.mxu0 %v1754_v41  ;;  %2603 = vmatpush3.bf16.msra.mxu1 %v2667_v25  ;;  %v2668_v41 = vld [vmem:[#allocation9 + $0x8] sm:$0xff]  }
 0x84e   :  { %2572 = vmatprep.subr.bf16.mxu0 %v2832_v0  ;;  %2604 = vmatprep.subr.bf16.mxu1 %v2832_v0 }
 0x850   :  { %2563 = vmatmul.mubr.msk.bf16.vlgmr.msra.gmra.mrb[56].mxu0 %vm178_vm4, %v1747_v26 }
 0x851   :  { %2573 = vmatpush3.bf16.msra.mxu0 %v1865_v29  ;;  %2574 = vmatprep.mubr.msk.bf16.mxu0 %vm2833_vm0, %v2832_v0 }
 0x852   :  { %2584 = vmatprep.subr.bf16.mxu0 %v2832_v0  ;;  %v2732_v37 = vpop.eup %2731  ;;  %2605 = vmatpush3.bf16.msra.mxu1 %v2668_v41 }
 0x853   :  { %v2096_v39 = vmul.f32 %v2732_v37, %v3306_v58 }
 0x855   :  { %v2097_v40 = vpack.c.bf16 %v2096_v39, %v2096_v39 }
 0x858   :  { %2575 = vmatmul.mubr.msk.bf16.vlgmr.msra.gmra.mrb[60].mxu0 %vm178_vm4, %v1858_v32 }
 0x859   :  { %2585 = vmatpush3.bf16.msra.mxu0 %v1993_v33  ;;  %2586 = vmatprep.mubr.msk.bf16.mxu0 %vm2833_vm0, %v2832_v0 }
 0x85a   :  { %2596 = vmatprep.subr.bf16.mxu0 %v2832_v0 }
 0x860   :  { %2587 = vmatmul.mubr.msk.bf16.vlgmr.msra.gmra.mrb[64].mxu0 %vm178_vm4, %v1986_v36 }
 0x861   :  { %2597 = vmatpush3.bf16.msra.mxu0 %v2104_v38  ;;  %2598 = vmatprep.mubr.msk.bf16.mxu0 %vm2833_vm0, %v2832_v0  ;;  %v2164_v0 = vld [vmem:[%s3396_s3] sm:$0x1] }
 0x862   :  { %v2165_v10 = vunpack.c.l.bf16 %v2164_v0 }
 0x864   :  { %v2169_v33 = vrot.slane %v2165_v10, %v1088_v17 }
 0x868   :  { %2599 = vmatmul.mubr.msk.bf16.vlgmr.msra.gmra.mrb[68].mxu0 %vm178_vm4, %v2097_v40 }
 0x8cd   :  { %v1318_v42 = vpop.f32.mrb[40].mxu0 }
 0x8ce   :  { %v2516_v43 = vpop.f32.mrb[41].mxu0 }
 0x8cf   :  { %v1321_v44 = vpop.f32.mrb[42].mxu0 }
 0x8d0   :  { %v2517_v48 = vpop.f32.mrb[43].mxu0 }
 0x8d5   :  { %v1429_v49 = vpop.f32.mrb[44].mxu0 }
 0x8d6   :  { %1436 = vrot.lane.b32.xlu0 %v1429_v49, %s2830_s28  ;;  %v2528_v45 = vpop.f32.mrb[45].mxu0 }
 0x8d7   :  { %v1432_v50 = vpop.f32.mrb[46].mxu0 }
 0x8d8   :  { %v2529_v51 = vpop.f32.mrb[47].mxu0 }
 0x8dd   :  { %v1551_v52 = vpop.f32.mrb[48].mxu0 }
 0x8de   :  { %v2540_v53 = vpop.f32.mrb[49].mxu0 }
 0x8df   :  { %v1554_v54 = vpop.f32.mrb[50].mxu0 }
 0x8e0   :  { %v2541_v55 = vpop.f32.mrb[51].mxu0 }
 0x90a   :  { %v1662_v56 = vpop.f32.mrb[52].mxu0 }
 0x90b   :  { %v2552_v57 = vpop.f32.mrb[53].mxu0 }
 0x90c   :  { %v1665_v58 = vpop.f32.mrb[54].mxu0 }
 0x90d   :  { %v2553_v59 = vpop.f32.mrb[55].mxu0 }
 0x923   :  { %v1790_v60 = vpop.f32.mrb[56].mxu0 }
 0x924   :  { %v2564_v61 = vpop.f32.mrb[57].mxu0 }
 0x925   :  { %v1793_v11 = vpop.f32.mrb[58].mxu0 }
 0x926   :  { %v2565_v62 = vpop.f32.mrb[59].mxu0 }
 0x92b   :  { %v1901_v63 = vpop.f32.mrb[60].mxu0 }
 0x92c   :  { %v2648_v1 = vpack.i.bf16 %v1901_v63, %v1662_v56  ;;  %v2576_v2 = vpop.f32.mrb[61].mxu0 }
 0x92d   :  { %v1904_v46 = vpop.f32.mrb[62].mxu0 }
 0x92e   :  { %2649 = vrot.lane.b32.xlu1 %v2648_v1, %s2830_s28  ;;  %v2577_v47 = vpop.f32.mrb[63].mxu0 }
 0x933   :  { %v2029_v3 = vpop.f32.mrb[64].mxu0 }
 0x934   :  { %v2588_v4 = vpop.f32.mrb[65].mxu0 }
 0x935   :  { %v2032_v5 = vpop.f32.mrb[66].mxu0 }
 0x936   :  { %v2589_v6 = vpop.f32.mrb[67].mxu0 }
 0x93b   :  { %v2140_v7 = vpop.f32.mrb[68].mxu0 }
 0x93c   :  { %2147 = vrot.lane.b32.xlu1 %v2140_v7, %s2830_s28  ;;  %v2600_v8 = vpop.f32.mrb[69].mxu0 }
 0x93d   :  { %v2143_v9 = vpop.f32.mrb[70].mxu0 }
 0x93e   :  { %v2601_v14 = vpop.f32.mrb[71].mxu0 }
 0x948   :  { %v1437_v15 = vpop.permute.xlu0 %1436 }
 0x949   :  { %v1439_v13 = vsel %vm130_vm3, %v1318_v42, %v1437_v15 }
 0x94a   :  { %v1440_v16 = vpack.c.bf16 %v1439_v13, %v1439_v13 }
 0x94c   :  { %1441 = vst.msk [vmem:[#allocation3] sm:$0xf] %vm357_vm6, %v1440_v16 }
 0x9a0   :  { %v2650_v18 = vpop.permute.xlu1 %2649 }
 0x9a1   :  { %v2652_v19 = vunpack.i.h.bf16 %v2650_v18  ;;  %v2651_v20 = vunpack.i.l.bf16 %v2650_v18 }
 0x9a3   :  { %v1911_v21 = vsel %vm130_vm3, %v1790_v60, %v2652_v19  ;;  %v1672_v22 = vsel %vm130_vm3, %v1551_v52, %v2651_v20 }
 0x9a4   :  { %v2308_v23 = vpack.c.bf16 %v1911_v21, %v1911_v21  ;;  %v2307_v24 = vpack.c.bf16 %v1672_v22, %v1672_v22 }
 0x9a6   :  { %1916 = vrot.lane.b32.xlu0 %v2308_v23, %s2856_s22  ;;  %1677 = vrot.lane.b32.xlu1 %v2307_v24, %s2857_s23 }
 0x9ae   :  { %v2148_v27 = vpop.permute.xlu1 %2147 }
 0x9af   :  { %v2150_v26 = vsel %vm130_vm3, %v2029_v3, %v2148_v27 }
 0x9b0   :  { %v2309_v28 = vpack.c.bf16 %v2150_v26, %v2150_v26 }
 0x9b2   :  { %2155 = vrot.lane.b32.xlu1 %v2309_v28, %s2858_s24 }
 0xa18   :  { %v1917_v29 = vpop.permute.xlu0 %1916  ;;  %v1678_v30 = vpop.permute.xlu1 %1677 }
 0xa19   :  { %1680 = vst.msk [vmem:[#allocation3] sm:$0xf] %vm597_vm7, %v1678_v30 }
 0xa1a   :  { %1919 = vst.msk [vmem:[#allocation3] sm:$0xf] %vm837_vm8, %v1917_v29 }
 0xa24   :  { %v2156_v31 = vpop.permute.xlu1 %2155 }
 0xa25   :  { %2158 = vst.msk [vmem:[#allocation3] sm:$0xf] %vm1077_vm9, %v2156_v31 }
 0xa2c   :  { %v2159_v32 = vld [vmem:[#allocation3] sm:$0xf] }
 0xa2d   :  { %2607 = vmatmul.mubr.msk.bf16.vlgmr.msra.gmra.mrb[68].mxu1 %vm77_vm1, %v2159_v32 }
 0xb00   :  { %v2219_v34 = vpop.f32.mrb[68].mxu1 }
 0xb01   :  { %v2220_v35 = vadd.f32 %v2219_v34, %v2169_v33  ;;  %v2608_v36 = vpop.f32.mrb[69].mxu1 }
 0xb02   :  { %v2222_v37 = vpop.f32.mrb[70].mxu1 }
 0xb03   :  { %v2225_v38 = vpack.c.bf16 %v2220_v35, %v2220_v35  ;;  %v2609_v39 = vpop.f32.mrb[71].mxu1 }
 0xb05   :  { %2227 = vst.msk [vmem:[#allocation10 + $0x4] sm:$0xf] %vm1146_vm10, %v2225_v38 }
 0xb06   :  { %2810 = shalt.err (!%p2807_p0)
}
 0xb07   :  { %s2811_s6 = scalar_lea.hbm %s3397_s4, 128 }
 0xb08   :  { %p2812_p1 = scmp.ne.s32.totalorder %s3397_s4, %s2811_s6  ;;  %p2815_p2 = scmp.lt.u32.totalorder %s2811_s6, %s3397_s4 }
 0xb0a   :  { %p2817_p3 = pnand %p2815_p2, %p2812_p1 }
 0xb0c   :  { %2820 = shalt.err (!%p2817_p3)
}
 0xb0d   :  { %2239 = dma.vmem_to_hbm [thread:$0]  %s2234_s29, 128, %s3397_s4, [#allocation6], %s2829_s27, %s2829_s27, %s2830_s28  }
 0xb0e   :  { %2825 = dma.done.wait [#allocation6], 128  }
 0xb0f   :  { %2826 = vsyncadd [#allocation6], 4294967168 }
 0xb10   :  { %2243 = vsyncpa [#allocation5], 1 }
 0xb11   :  { %2244 = vsyncpa [#allocation8], 1 }
 0xb12   :  { %2245 = vsyncpa [#allocation6], 1 }

</bundles_post_ra>
